<compile_context>
chip_gen: v7x
topology: tpu7x:2x2x1
jax: 0.10.0
libtpu: 0.0.40
codegen_flags: <defaults>
</compile_context>

<pallas_src>
import functools

import numpy as np
import jax
import jax.numpy as jnp
from jax import lax
from jax.experimental import pallas as pl
from jax.experimental.pallas import tpu as pltpu


# =============================================================================
# Host-side, one-time packing: each conv level becomes ONE dense [K, N] matrix
# acting on channel-major (NCHW-flattened) images.
#   idx(c, y, x) = c*(h*w) + y*w + x
# =============================================================================
def _pack_stride2_conv(w, b, h_in, w_in):
    """3x3 stride-2 pad-1 conv as one matmul on the channel-major flat image."""
    w = np.asarray(w, np.float32)
    b = np.asarray(b, np.float32)
    _, _, c_in, c_out = w.shape
    h_out, w_out = h_in // 2, w_in // 2
    hw_in, hw_out = h_in * w_in, h_out * w_out
    M = np.zeros((c_in * hw_in, c_out * hw_out), np.float32)
    k_ch = (np.arange(c_in) * hw_in)[:, None]
    n_ch = (np.arange(c_out) * hw_out)[None, :]
    for Y in range(h_out):
        for X in range(w_out):
            n_idx = n_ch + (Y * w_out + X)
            for di in range(3):
                r = 2 * Y + di - 1
                if not (0 <= r < h_in):
                    continue
                for dj in range(3):
                    c = 2 * X + dj - 1
                    if not (0 <= c < w_in):
                        continue
                    M[k_ch + (r * w_in + c), n_idx] += w[di, dj]
    bias = np.repeat(b, hw_out).reshape(1, c_out * hw_out)
    return M, bias


def _pack_1x1_conv(w, b, h_sp, w_sp):
    """1x1 conv as one matmul on the channel-major flat image."""
    w = np.asarray(w, np.float32)
    b = np.asarray(b, np.float32)
    c_in, c_out = w.shape[2], w.shape[3]
    hw = h_sp * w_sp
    M = np.zeros((c_in * hw, c_out * hw), np.float32)
    k_ch = (np.arange(c_in) * hw)[:, None]
    n_ch = (np.arange(c_out) * hw)[None, :]
    for s in range(hw):
        M[k_ch + s, n_ch + s] = w[0, 0]
    bias = np.repeat(b, hw).reshape(1, c_out * hw)
    return M, bias


def _pack_upconv(w, b, h_in, w_in):
    """nearest-2x upsample + 3x3 stride-1 pad-1 conv as ONE matmul (upsample folded)."""
    w = np.asarray(w, np.float32)
    b = np.asarray(b, np.float32)
    _, _, c_in, c_out = w.shape
    H, W = 2 * h_in, 2 * w_in
    hw_in, hw_out = h_in * w_in, H * W
    M = np.zeros((c_in * hw_in, c_out * hw_out), np.float32)
    k_ch = (np.arange(c_in) * hw_in)[:, None]
    n_ch = (np.arange(c_out) * hw_out)[None, :]
    for Y in range(H):
        for X in range(W):
            n_idx = n_ch + (Y * W + X)
            for di in range(3):
                r = Y + di - 1
                if not (0 <= r < H):
                    continue
                for dj in range(3):
                    c = X + dj - 1
                    if not (0 <= c < W):
                        continue
                    # nearest-neighbour upsample: upsampled (r, c) reads input (r//2, c//2)
                    M[k_ch + ((r // 2) * w_in + (c // 2)), n_idx] += w[di, dj]
    bias = np.repeat(b, hw_out).reshape(1, c_out * hw_out)
    return M, bias


# =============================================================================
# Fused Pallas kernel: the whole autoencoder forward for ONE batch tile.
# =============================================================================
def _fused_ae_kernel(x_ref, *refs, deep):
    """refs = (w_0, b_0, ..., w_{2*deep}, b_{2*deep}, xhat_ref, encf_ref, decf_ref).

    Activation layout: [TB, C*H*W] channel-major slab (batch on sublanes,
    channel*spatial on lanes). Every layer = one bf16 MXU matmul + f32 epilogue.
    """
    nl = 2 * deep + 1
    w_refs = refs[0:2 * nl:2]
    b_refs = refs[1:2 * nl:2]
    xhat_ref, encf_ref, decf_ref = refs[2 * nl:]
    f32 = jnp.float32
    bf16 = jnp.bfloat16

    def dense(h, idx):
        z = jnp.dot(h.astype(bf16), w_refs[idx][...],
                    preferred_element_type=f32)       # bf16 passes, f32 accumulate
        return z + b_refs[idx][...]                   # bias / epilogue stay f32

    h = x_ref[...]                                    # [TB, in_ch*H*W] f32

    # ---- encoder: deep x (3x3 stride-2 conv + ReLU) ----
    for d in range(deep):
        h = jnp.maximum(dense(h, d), 0.0)
    encf_ref[...] = h                                 # [TB, enc_ch*fs*fs] (lane-dense)

    # ---- map_to_dec_features: 1x1 conv + ReLU ----
    g = jnp.maximum(dense(h, deep), 0.0)
    decf_ref[...] = g

    # ---- decoder: deep x (nearest 2x upsample + 3x3 conv); ReLU, final sigmoid ----
    for d in range(deep):
        z = dense(g, deep + 1 + d)
        if d < deep - 1:
            g = jnp.maximum(z, 0.0)
        else:
            g = pl.reciprocal(1.0 + jnp.exp(-z), approx=True)   # sigmoid on EUP
    xhat_ref[...] = g                                 # [TB, in_ch*H*W] (lane-dense)


@functools.partial(jax.jit, static_argnames=("deep", "in_ch", "enc_ch", "img_size"))
def _ae_forward(weights, biases, x_nchw, *, deep, in_ch, enc_ch, img_size):
    B = x_nchw.shape[0]
    H = W = img_size
    fs = img_size // (2 ** deep)
    d_in = in_ch * H * W
    d_feat = enc_ch * fs * fs

    # NCHW -> channel-major flat slab: a pure reshape (no transpose, no HBM shuffle).
    x_flat = x_nchw.reshape(B, d_in).astype(jnp.float32)

    # Batch tile fills the MXU M dimension (target 256 rows for v6e/v7x) and
    # amortizes the ~0.35us/grid-step overhead; large B yields >=2 "parallel"
    # grid steps so both v7x TensorCores get work.
    tb = min(B, 256)
    nb = pl.cdiv(B, tb)
    b_pad = nb * tb
    if b_pad != B:
        x_flat = jnp.pad(x_flat, ((0, b_pad - B), (0, 0)))

    consts = []
    for wm, bias in zip(weights, biases):
        consts += [wm, bias]

    in_specs = [pl.BlockSpec((tb, d_in), lambda i: (i, 0))]
    for a in consts:
        in_specs.append(pl.BlockSpec(a.shape, lambda i: (0, 0)))   # fetched once

    out_shape = (
        jax.ShapeDtypeStruct((b_pad, d_in), jnp.float32),
        jax.ShapeDtypeStruct((b_pad, d_feat), jnp.float32),
        jax.ShapeDtypeStruct((b_pad, d_feat), jnp.float32),
    )
    out_specs = (
        pl.BlockSpec((tb, d_in), lambda i: (i, 0)),
        pl.BlockSpec((tb, d_feat), lambda i: (i, 0)),
        pl.BlockSpec((tb, d_feat), lambda i: (i, 0)),
    )

    xh, ef, df = pl.pallas_call(
        functools.partial(_fused_ae_kernel, deep=deep),
        grid=(nb,),
        in_specs=in_specs,
        out_specs=out_specs,
        out_shape=out_shape,
        compiler_params=pltpu.CompilerParams(dimension_semantics=("parallel",)),
    )(x_flat, *consts)

    # Slabs are already NCHW-flat -> pure reshapes, zero transposes.
    latent = ef[:B]                                   # == NCHW flatten(1) of enc_f
    x_hat = xh[:B].reshape(B, in_ch, H, W)
    enc_f = latent.reshape(B, enc_ch, fs, fs)
    dec_f = df[:B].reshape(B, enc_ch, fs, fs)
    return x_hat, enc_f, dec_f, latent


# =============================================================================
# Concrete BaseAe
# =============================================================================
class BaseAePallas:
    """Concrete autoencoder matching the BaseAe interface; forward() is one fused Pallas kernel."""

    def __init__(self, img_size: int, in_ch: int = 1, deep: int = 3, base_ch: int = 8, key=None):
        assert img_size % (2 ** deep) == 0
        self._img_size = img_size
        self._deep = deep
        self._in_ch = in_ch
        if key is None:
            key = jax.random.PRNGKey(0)

        enc_chs = [in_ch] + [base_ch * (2 ** d) for d in range(deep)]
        dec_chs = list(reversed(enc_chs))
        self._enc_chs, self._dec_chs = enc_chs, dec_chs

        keys = list(jax.random.split(key, 4 * deep + 2))
        nk = lambda: keys.pop(0)
        self.params = {}
        for d in range(deep):                            # encoder 3x3 stride-2 convs
            cin, cout = enc_chs[d], enc_chs[d + 1]
            self.params[f"enc_w{d}"] = 0.1 * jax.random.normal(nk(), (3, 3, cin, cout), jnp.float32)
            self.params[f"enc_b{d}"] = 0.05 * jax.random.normal(nk(), (cout,), jnp.float32)
        c = enc_chs[-1]                                  # 1x1 map conv
        self.params["map_w"] = 0.1 * jax.random.normal(nk(), (1, 1, c, c), jnp.float32)
        self.params["map_b"] = 0.05 * jax.random.normal(nk(), (c,), jnp.float32)
        for d in range(deep):                            # decoder 3x3 convs (after 2x upsample)
            cin, cout = dec_chs[d], dec_chs[d + 1]
            self.params[f"dec_w{d}"] = 0.1 * jax.random.normal(nk(), (3, 3, cin, cout), jnp.float32)
            self.params[f"dec_b{d}"] = 0.05 * jax.random.normal(nk(), (cout,), jnp.float32)

        # One-time packing: one [K, N] matrix per level, channel-major layout.
        weights, biases = [], []
        h = img_size
        for d in range(deep):
            M, bias = _pack_stride2_conv(self.params[f"enc_w{d}"], self.params[f"enc_b{d}"], h, h)
            weights.append(jnp.asarray(M, jnp.bfloat16))
            biases.append(jnp.asarray(bias, jnp.float32))
            h //= 2
        M, bias = _pack_1x1_conv(self.params["map_w"], self.params["map_b"], h, h)
        weights.append(jnp.asarray(M, jnp.bfloat16))
        biases.append(jnp.asarray(bias, jnp.float32))
        for d in range(deep):
            M, bias = _pack_upconv(self.params[f"dec_w{d}"], self.params[f"dec_b{d}"], h, h)
            weights.append(jnp.asarray(M, jnp.bfloat16))
            biases.append(jnp.asarray(bias, jnp.float32))
            h *= 2
        self._weights = tuple(weights)
        self._biases = tuple(biases)

    # --- properties mirroring the abstract interface ---
    @property
    def n_enc_features_ch(self) -> int:
        return self._enc_chs[-1]

    @property
    def n_dec_features_ch(self) -> int:
        return self._dec_chs[0]

    @property
    def n_features_size(self) -> int:
        return self._img_size // (2 ** self._deep)

    # --- fused Pallas forward (NCHW in / NCHW out, like the PyTorch module) ---
    def forward(self, x_nchw):
        return _ae_forward(self._weights, self._biases, x_nchw,
                           deep=self._deep, in_ch=self._in_ch,
                           enc_ch=self._enc_chs[-1], img_size=self._img_size)

    __call__ = forward

    # --- pure-JAX (XLA) reference path; also serves the abstract encode/decode API ---
    def encode(self, x_nhwc):
        dn = ("NHWC", "HWIO", "NHWC")
        h = x_nhwc
        for d in range(self._deep):
            h = lax.conv_general_dilated(h, self.params[f"enc_w{d}"], (2, 2), ((1, 1), (1, 1)),
                                         dimension_numbers=dn, precision=lax.Precision.HIGHEST)
            h = jnp.maximum(h + self.params[f"enc_b{d}"], 0.0)
        return h

    def map_to_dec_features(self, enc_features):
        dn = ("NHWC", "HWIO", "NHWC")
        g = lax.conv_general_dilated(enc_features, self.params["map_w"], (1, 1), ((0, 0), (0, 0)),
                                     dimension_numbers=dn, precision=lax.Precision.HIGHEST)
        g = jnp.maximum(g + self.params["map_b"], 0.0)
        return g, enc_features

    def decode(self, features):
        dn = ("NHWC", "HWIO", "NHWC")
        g = features
        for d in range(self._deep):
            g = jnp.repeat(jnp.repeat(g, 2, axis=1), 2, axis=2)
            g = lax.conv_general_dilated(g, self.params[f"dec_w{d}"], (1, 1), ((1, 1), (1, 1)),
                                         dimension_numbers=dn, precision=lax.Precision.HIGHEST)
            g = g + self.params[f"dec_b{d}"]
            g = jnp.maximum(g, 0.0) if d < self._deep - 1 else jax.nn.sigmoid(g)
        return g

    def reference_forward(self, x_nchw):
        x = jnp.transpose(x_nchw, (0, 2, 3, 1))
        enc = self.encode(x)
        dec, enc = self.map_to_dec_features(enc)
        xh = self.decode(dec)
        to_nchw = lambda a: jnp.transpose(a, (0, 3, 1, 2))
        enc_n = to_nchw(enc)
        return to_nchw(xh), enc_n, to_nchw(dec), enc_n.reshape(enc_n.shape[0], -1)

    def extra_repr(self) -> str:
        return f"img_size={self._img_size}, deep={self._deep}, img_channels={self._in_ch},  "


if __name__ == "__main__":
    key = jax.random.PRNGKey(0)
    k_x, k_p = jax.random.split(key)

    B, C, H, W = 2, 1, 16, 16                 # img_size=16, in_ch=1 (module default), deep=3
    x = jax.random.normal(k_x, (B, C, H, W), jnp.float32)

    model = BaseAePallas(img_size=H, in_ch=C, deep=3, key=k_p)
    x_hat, enc_f, dec_f, latent = model.forward(x)
    jax.block_until_ready((x_hat, enc_f, dec_f, latent))

    # shape / sanity checks
    fs, ec = model.n_features_size, model.n_enc_features_ch
    assert x_hat.shape == (B, C, H, W)
    assert enc_f.shape == (B, ec, fs, fs)
    assert dec_f.shape == (B, model.n_dec_features_ch, fs, fs)
    assert latent.shape == (B, ec * fs * fs)
    assert bool(jnp.all(jnp.isfinite(x_hat)))

    # numerical check against the pure-JAX (XLA conv, HIGHEST precision) reference path;
    # kernel runs bf16 MXU passes with f32 accumulate, so allow ~1e-2-scale deviation.
    r_xh, r_enc, r_dec, r_lat = model.reference_forward(x)
    assert float(jnp.max(jnp.abs(x_hat - r_xh))) < 2e-2
    assert float(jnp.max(jnp.abs(enc_f - r_enc))) < 2e-2
    assert float(jnp.max(jnp.abs(dec_f - r_dec))) < 2e-2
    assert float(jnp.max(jnp.abs(latent - r_lat))) < 2e-2

    print("KERNEL_OK")
</pallas_src>

<mosaic_0001>
module attributes {stable_mosaic.version = 11 : i64} {
  func.func @_fused_ae_kernel(%arg0: i32, %arg1: memref<2x256xf32, #tpu.memory_space<vmem>>, %arg2: memref<256x512xbf16, #tpu.memory_space<vmem>>, %arg3: memref<1x512xf32, #tpu.memory_space<vmem>>, %arg4: memref<512x256xbf16, #tpu.memory_space<vmem>>, %arg5: memref<1x256xf32, #tpu.memory_space<vmem>>, %arg6: memref<256x128xbf16, #tpu.memory_space<vmem>>, %arg7: memref<1x128xf32, #tpu.memory_space<vmem>>, %arg8: memref<128x128xbf16, #tpu.memory_space<vmem>>, %arg9: memref<1x128xf32, #tpu.memory_space<vmem>>, %arg10: memref<128x256xbf16, #tpu.memory_space<vmem>>, %arg11: memref<1x256xf32, #tpu.memory_space<vmem>>, %arg12: memref<256x512xbf16, #tpu.memory_space<vmem>>, %arg13: memref<1x512xf32, #tpu.memory_space<vmem>>, %arg14: memref<512x256xbf16, #tpu.memory_space<vmem>>, %arg15: memref<1x256xf32, #tpu.memory_space<vmem>>, %arg16: memref<2x256xf32, #tpu.memory_space<vmem>>, %arg17: memref<2x128xf32, #tpu.memory_space<vmem>>, %arg18: memref<2x128xf32, #tpu.memory_space<vmem>>) attributes {dimension_semantics = [#tpu.dimension_semantics<parallel>], iteration_bounds = array<i64: 1>, scalar_prefetch = 0 : i64, scratch_operands = 0 : i64, tpu.core_type = #tpu.core_type<tc>, window_params = [{transform_indices = @transform_0, window_bounds = array<i64: 2, 256>}, {pipeline_mode = #tpu.pipeline_mode<synchronous>, transform_indices = @transform_1, window_bounds = array<i64: 256, 512>}, {pipeline_mode = #tpu.pipeline_mode<synchronous>, transform_indices = @transform_2, window_bounds = array<i64: 1, 512>}, {pipeline_mode = #tpu.pipeline_mode<synchronous>, transform_indices = @transform_3, window_bounds = array<i64: 512, 256>}, {pipeline_mode = #tpu.pipeline_mode<synchronous>, transform_indices = @transform_4, window_bounds = array<i64: 1, 256>}, {pipeline_mode = #tpu.pipeline_mode<synchronous>, transform_indices = @transform_5, window_bounds = array<i64: 256, 128>}, {pipeline_mode = #tpu.pipeline_mode<synchronous>, transform_indices = @transform_6, window_bounds = array<i64: 1, 128>}, {pipeline_mode = #tpu.pipeline_mode<synchronous>, transform_indices = @transform_7, window_bounds = array<i64: 128, 128>}, {pipeline_mode = #tpu.pipeline_mode<synchronous>, transform_indices = @transform_8, window_bounds = array<i64: 1, 128>}, {pipeline_mode = #tpu.pipeline_mode<synchronous>, transform_indices = @transform_9, window_bounds = array<i64: 128, 256>}, {pipeline_mode = #tpu.pipeline_mode<synchronous>, transform_indices = @transform_10, window_bounds = array<i64: 1, 256>}, {pipeline_mode = #tpu.pipeline_mode<synchronous>, transform_indices = @transform_11, window_bounds = array<i64: 256, 512>}, {pipeline_mode = #tpu.pipeline_mode<synchronous>, transform_indices = @transform_12, window_bounds = array<i64: 1, 512>}, {pipeline_mode = #tpu.pipeline_mode<synchronous>, transform_indices = @transform_13, window_bounds = array<i64: 512, 256>}, {pipeline_mode = #tpu.pipeline_mode<synchronous>, transform_indices = @transform_14, window_bounds = array<i64: 1, 256>}, {transform_indices = @transform_15, window_bounds = array<i64: 2, 256>}, {transform_indices = @transform_16, window_bounds = array<i64: 2, 128>}, {transform_indices = @transform_17, window_bounds = array<i64: 2, 128>}]} {
    %c0 = arith.constant 0 : index
    %c0_0 = arith.constant 0 : index
    %0 = vector.load %arg1[%c0, %c0_0] : memref<2x256xf32, #tpu.memory_space<vmem>>, vector<2x256xf32>
    %1 = arith.truncf %0 : vector<2x256xf32> to vector<2x256xbf16>
    %c0_1 = arith.constant 0 : index
    %c0_2 = arith.constant 0 : index
    %2 = vector.load %arg2[%c0_1, %c0_2] : memref<256x512xbf16, #tpu.memory_space<vmem>>, vector<256x512xbf16>
    %cst = arith.constant dense<0.000000e+00> : vector<2x512xf32>
    %3 = tpu.matmul %1, %2, %cst {dimension_numbers = #tpu.dot_dimension_numbers<[1], [0], [0], [1], [0, 0, 1, 1], [], []>} : vector<2x256xbf16>, vector<256x512xbf16>, vector<2x512xf32> -> vector<2x512xf32>
    %c0_3 = arith.constant 0 : index
    %c0_4 = arith.constant 0 : index
    %4 = vector.load %arg3[%c0_3, %c0_4] : memref<1x512xf32, #tpu.memory_space<vmem>>, vector<1x512xf32>
    %5 = vector.broadcast %4 : vector<1x512xf32> to vector<2x512xf32>
    %6 = arith.addf %3, %5 : vector<2x512xf32>
    %cst_5 = arith.constant 0.000000e+00 : f32
    %7 = vector.broadcast %cst_5 : f32 to vector<2x512xf32>
    %8 = arith.maximumf %6, %7 : vector<2x512xf32>
    %9 = arith.truncf %8 : vector<2x512xf32> to vector<2x512xbf16>
    %c0_6 = arith.constant 0 : index
    %c0_7 = arith.constant 0 : index
    %10 = vector.load %arg4[%c0_6, %c0_7] : memref<512x256xbf16, #tpu.memory_space<vmem>>, vector<512x256xbf16>
    %cst_8 = arith.constant dense<0.000000e+00> : vector<2x256xf32>
    %11 = tpu.matmul %9, %10, %cst_8 {dimension_numbers = #tpu.dot_dimension_numbers<[1], [0], [0], [1], [0, 0, 1, 1], [], []>} : vector<2x512xbf16>, vector<512x256xbf16>, vector<2x256xf32> -> vector<2x256xf32>
    %c0_9 = arith.constant 0 : index
    %c0_10 = arith.constant 0 : index
    %12 = vector.load %arg5[%c0_9, %c0_10] : memref<1x256xf32, #tpu.memory_space<vmem>>, vector<1x256xf32>
    %13 = vector.broadcast %12 : vector<1x256xf32> to vector<2x256xf32>
    %14 = arith.addf %11, %13 : vector<2x256xf32>
    %cst_11 = arith.constant 0.000000e+00 : f32
    %15 = vector.broadcast %cst_11 : f32 to vector<2x256xf32>
    %16 = arith.maximumf %14, %15 : vector<2x256xf32>
    %17 = arith.truncf %16 : vector<2x256xf32> to vector<2x256xbf16>
    %c0_12 = arith.constant 0 : index
    %c0_13 = arith.constant 0 : index
    %18 = vector.load %arg6[%c0_12, %c0_13] : memref<256x128xbf16, #tpu.memory_space<vmem>>, vector<256x128xbf16>
    %cst_14 = arith.constant dense<0.000000e+00> : vector<2x128xf32>
    %19 = tpu.matmul %17, %18, %cst_14 {dimension_numbers = #tpu.dot_dimension_numbers<[1], [0], [0], [1], [0, 0, 1, 1], [], []>} : vector<2x256xbf16>, vector<256x128xbf16>, vector<2x128xf32> -> vector<2x128xf32>
    %c0_15 = arith.constant 0 : index
    %c0_16 = arith.constant 0 : index
    %20 = vector.load %arg7[%c0_15, %c0_16] : memref<1x128xf32, #tpu.memory_space<vmem>>, vector<1x128xf32>
    %21 = vector.broadcast %20 : vector<1x128xf32> to vector<2x128xf32>
    %22 = arith.addf %19, %21 : vector<2x128xf32>
    %cst_17 = arith.constant 0.000000e+00 : f32
    %23 = vector.broadcast %cst_17 : f32 to vector<2x128xf32>
    %24 = arith.maximumf %22, %23 : vector<2x128xf32>
    %c0_18 = arith.constant 0 : index
    %c0_19 = arith.constant 0 : index
    %25 = vector.load %arg17[%c0_18, %c0_19] : memref<2x128xf32, #tpu.memory_space<vmem>>, vector<2x128xf32>
    tpu.vector_store %arg17[%c0_18, %c0_19], %24 {strides = array<i32>} : memref<2x128xf32, #tpu.memory_space<vmem>>, vector<2x128xf32>,
    %26 = arith.truncf %24 : vector<2x128xf32> to vector<2x128xbf16>
    %c0_20 = arith.constant 0 : index
    %c0_21 = arith.constant 0 : index
    %27 = vector.load %arg8[%c0_20, %c0_21] : memref<128x128xbf16, #tpu.memory_space<vmem>>, vector<128x128xbf16>
    %cst_22 = arith.constant dense<0.000000e+00> : vector<2x128xf32>
    %28 = tpu.matmul %26, %27, %cst_22 {dimension_numbers = #tpu.dot_dimension_numbers<[1], [0], [0], [1], [0, 0, 1, 1], [], []>} : vector<2x128xbf16>, vector<128x128xbf16>, vector<2x128xf32> -> vector<2x128xf32>
    %c0_23 = arith.constant 0 : index
    %c0_24 = arith.constant 0 : index
    %29 = vector.load %arg9[%c0_23, %c0_24] : memref<1x128xf32, #tpu.memory_space<vmem>>, vector<1x128xf32>
    %30 = vector.broadcast %29 : vector<1x128xf32> to vector<2x128xf32>
    %31 = arith.addf %28, %30 : vector<2x128xf32>
    %cst_25 = arith.constant 0.000000e+00 : f32
    %32 = vector.broadcast %cst_25 : f32 to vector<2x128xf32>
    %33 = arith.maximumf %31, %32 : vector<2x128xf32>
    %c0_26 = arith.constant 0 : index
    %c0_27 = arith.constant 0 : index
    %34 = vector.load %arg18[%c0_26, %c0_27] : memref<2x128xf32, #tpu.memory_space<vmem>>, vector<2x128xf32>
    tpu.vector_store %arg18[%c0_26, %c0_27], %33 {strides = array<i32>} : memref<2x128xf32, #tpu.memory_space<vmem>>, vector<2x128xf32>,
    %35 = arith.truncf %33 : vector<2x128xf32> to vector<2x128xbf16>
    %c0_28 = arith.constant 0 : index
    %c0_29 = arith.constant 0 : index
    %36 = vector.load %arg10[%c0_28, %c0_29] : memref<128x256xbf16, #tpu.memory_space<vmem>>, vector<128x256xbf16>
    %cst_30 = arith.constant dense<0.000000e+00> : vector<2x256xf32>
    %37 = tpu.matmul %35, %36, %cst_30 {dimension_numbers = #tpu.dot_dimension_numbers<[1], [0], [0], [1], [0, 0, 1, 1], [], []>} : vector<2x128xbf16>, vector<128x256xbf16>, vector<2x256xf32> -> vector<2x256xf32>
    %c0_31 = arith.constant 0 : index
    %c0_32 = arith.constant 0 : index
    %38 = vector.load %arg11[%c0_31, %c0_32] : memref<1x256xf32, #tpu.memory_space<vmem>>, vector<1x256xf32>
    %39 = vector.broadcast %38 : vector<1x256xf32> to vector<2x256xf32>
    %40 = arith.addf %37, %39 : vector<2x256xf32>
    %cst_33 = arith.constant 0.000000e+00 : f32
    %41 = vector.broadcast %cst_33 : f32 to vector<2x256xf32>
    %42 = arith.maximumf %40, %41 : vector<2x256xf32>
    %43 = arith.truncf %42 : vector<2x256xf32> to vector<2x256xbf16>
    %c0_34 = arith.constant 0 : index
    %c0_35 = arith.constant 0 : index
    %44 = vector.load %arg12[%c0_34, %c0_35] : memref<256x512xbf16, #tpu.memory_space<vmem>>, vector<256x512xbf16>
    %cst_36 = arith.constant dense<0.000000e+00> : vector<2x512xf32>
    %45 = tpu.matmul %43, %44, %cst_36 {dimension_numbers = #tpu.dot_dimension_numbers<[1], [0], [0], [1], [0, 0, 1, 1], [], []>} : vector<2x256xbf16>, vector<256x512xbf16>, vector<2x512xf32> -> vector<2x512xf32>
    %c0_37 = arith.constant 0 : index
    %c0_38 = arith.constant 0 : index
    %46 = vector.load %arg13[%c0_37, %c0_38] : memref<1x512xf32, #tpu.memory_space<vmem>>, vector<1x512xf32>
    %47 = vector.broadcast %46 : vector<1x512xf32> to vector<2x512xf32>
    %48 = arith.addf %45, %47 : vector<2x512xf32>
    %cst_39 = arith.constant 0.000000e+00 : f32
    %49 = vector.broadcast %cst_39 : f32 to vector<2x512xf32>
    %50 = arith.maximumf %48, %49 : vector<2x512xf32>
    %51 = arith.truncf %50 : vector<2x512xf32> to vector<2x512xbf16>
    %c0_40 = arith.constant 0 : index
    %c0_41 = arith.constant 0 : index
    %52 = vector.load %arg14[%c0_40, %c0_41] : memref<512x256xbf16, #tpu.memory_space<vmem>>, vector<512x256xbf16>
    %cst_42 = arith.constant dense<0.000000e+00> : vector<2x256xf32>
    %53 = tpu.matmul %51, %52, %cst_42 {dimension_numbers = #tpu.dot_dimension_numbers<[1], [0], [0], [1], [0, 0, 1, 1], [], []>} : vector<2x512xbf16>, vector<512x256xbf16>, vector<2x256xf32> -> vector<2x256xf32>
    %c0_43 = arith.constant 0 : index
    %c0_44 = arith.constant 0 : index
    %54 = vector.load %arg15[%c0_43, %c0_44] : memref<1x256xf32, #tpu.memory_space<vmem>>, vector<1x256xf32>
    %55 = vector.broadcast %54 : vector<1x256xf32> to vector<2x256xf32>
    %56 = arith.addf %53, %55 : vector<2x256xf32>
    %cst_45 = arith.constant 0.000000e+00 : f32
    %57 = vector.broadcast %cst_45 : f32 to vector<2x256xf32>
    %58 = arith.subf %57, %56 : vector<2x256xf32>
    %59 = math.exp %58 : vector<2x256xf32>
    %cst_46 = arith.constant 1.000000e+00 : f32
    %60 = vector.broadcast %cst_46 : f32 to vector<2x256xf32>
    %61 = arith.addf %60, %59 : vector<2x256xf32>
    %62 = tpu.reciprocal %61 {approx = true} : vector<2x256xf32> -> vector<2x256xf32>
    %c0_47 = arith.constant 0 : index
    %c0_48 = arith.constant 0 : index
    %63 = vector.load %arg16[%c0_47, %c0_48] : memref<2x256xf32, #tpu.memory_space<vmem>>, vector<2x256xf32>
    tpu.vector_store %arg16[%c0_47, %c0_48], %62 {strides = array<i32>} : memref<2x256xf32, #tpu.memory_space<vmem>>, vector<2x256xf32>,
    return
  }
  func.func @transform_0(%arg0: i32) -> (i32, i32) {
    %c0_i32 = arith.constant 0 : i32
    %c0_i32_0 = arith.constant 0 : i32
    return %arg0, %c0_i32 : i32, i32
  }
  func.func @transform_1(%arg0: i32) -> (i32, i32) {
    %c0_i32 = arith.constant 0 : i32
    %c0_i32_0 = arith.constant 0 : i32
    %c0_i32_1 = arith.constant 0 : i32
    return %c0_i32, %c0_i32_0 : i32, i32
  }
  func.func @transform_2(%arg0: i32) -> (i32, i32) {
    %c0_i32 = arith.constant 0 : i32
    %c0_i32_0 = arith.constant 0 : i32
    %c0_i32_1 = arith.constant 0 : i32
    return %c0_i32, %c0_i32_0 : i32, i32
  }
  func.func @transform_3(%arg0: i32) -> (i32, i32) {
    %c0_i32 = arith.constant 0 : i32
    %c0_i32_0 = arith.constant 0 : i32
    %c0_i32_1 = arith.constant 0 : i32
    return %c0_i32, %c0_i32_0 : i32, i32
  }
  func.func @transform_4(%arg0: i32) -> (i32, i32) {
    %c0_i32 = arith.constant 0 : i32
    %c0_i32_0 = arith.constant 0 : i32
    %c0_i32_1 = arith.constant 0 : i32
    return %c0_i32, %c0_i32_0 : i32, i32
  }
  func.func @transform_5(%arg0: i32) -> (i32, i32) {
    %c0_i32 = arith.constant 0 : i32
    %c0_i32_0 = arith.constant 0 : i32
    %c0_i32_1 = arith.constant 0 : i32
    return %c0_i32, %c0_i32_0 : i32, i32
  }
  func.func @transform_6(%arg0: i32) -> (i32, i32) {
    %c0_i32 = arith.constant 0 : i32
    %c0_i32_0 = arith.constant 0 : i32
    %c0_i32_1 = arith.constant 0 : i32
    return %c0_i32, %c0_i32_0 : i32, i32
  }
  func.func @transform_7(%arg0: i32) -> (i32, i32) {
    %c0_i32 = arith.constant 0 : i32
    %c0_i32_0 = arith.constant 0 : i32
    %c0_i32_1 = arith.constant 0 : i32
    return %c0_i32, %c0_i32_0 : i32, i32
  }
  func.func @transform_8(%arg0: i32) -> (i32, i32) {
    %c0_i32 = arith.constant 0 : i32
    %c0_i32_0 = arith.constant 0 : i32
    %c0_i32_1 = arith.constant 0 : i32
    return %c0_i32, %c0_i32_0 : i32, i32
  }
  func.func @transform_9(%arg0: i32) -> (i32, i32) {
    %c0_i32 = arith.constant 0 : i32
    %c0_i32_0 = arith.constant 0 : i32
    %c0_i32_1 = arith.constant 0 : i32
    return %c0_i32, %c0_i32_0 : i32, i32
  }
  func.func @transform_10(%arg0: i32) -> (i32, i32) {
    %c0_i32 = arith.constant 0 : i32
    %c0_i32_0 = arith.constant 0 : i32
    %c0_i32_1 = arith.constant 0 : i32
    return %c0_i32, %c0_i32_0 : i32, i32
  }
  func.func @transform_11(%arg0: i32) -> (i32, i32) {
    %c0_i32 = arith.constant 0 : i32
    %c0_i32_0 = arith.constant 0 : i32
    %c0_i32_1 = arith.constant 0 : i32
    return %c0_i32, %c0_i32_0 : i32, i32
  }
  func.func @transform_12(%arg0: i32) -> (i32, i32) {
    %c0_i32 = arith.constant 0 : i32
    %c0_i32_0 = arith.constant 0 : i32
    %c0_i32_1 = arith.constant 0 : i32
    return %c0_i32, %c0_i32_0 : i32, i32
  }
  func.func @transform_13(%arg0: i32) -> (i32, i32) {
    %c0_i32 = arith.constant 0 : i32
    %c0_i32_0 = arith.constant 0 : i32
    %c0_i32_1 = arith.constant 0 : i32
    return %c0_i32, %c0_i32_0 : i32, i32
  }
  func.func @transform_14(%arg0: i32) -> (i32, i32) {
    %c0_i32 = arith.constant 0 : i32
    %c0_i32_0 = arith.constant 0 : i32
    %c0_i32_1 = arith.constant 0 : i32
    return %c0_i32, %c0_i32_0 : i32, i32
  }
  func.func @transform_15(%arg0: i32) -> (i32, i32) {
    %c0_i32 = arith.constant 0 : i32
    %c0_i32_0 = arith.constant 0 : i32
    return %arg0, %c0_i32 : i32, i32
  }
  func.func @transform_16(%arg0: i32) -> (i32, i32) {
    %c0_i32 = arith.constant 0 : i32
    %c0_i32_0 = arith.constant 0 : i32
    return %arg0, %c0_i32 : i32, i32
  }
  func.func @transform_17(%arg0: i32) -> (i32, i32) {
    %c0_i32 = arith.constant 0 : i32
    %c0_i32_0 = arith.constant 0 : i32
    return %arg0, %c0_i32 : i32, i32
  }
}

</mosaic_0001>

<bundles_post_ra>
// kernel: _ae_forward.1
= control target key start
LH: loop header
LB: loop body
LE: loop exit
PB: predicated region body
PF: predicated region fallthrough
CT: control target
= control target key end

     0   :  { %s3878_s0 = inlined_call_operand.vmem [shape: f32[2,256], index: 0, kind: input, shape index: {}]   ;;  %s3879_s1 = inlined_call_operand.hbm [shape: bf16[256,512], index: 1, kind: input, shape index: {}]   ;;  %s3880_s2 = inlined_call_operand.vmem [shape: f32[1,512], index: 2, kind: input, shape index: {}]   ;;  %s3881_s3 = inlined_call_operand.hbm [shape: bf16[512,256], index: 3, kind: input, shape index: {}]   ;;  %s3882_s4 = inlined_call_operand.vmem [shape: f32[1,256], index: 4, kind: input, shape index: {}]   ;;  %s3883_s5 = inlined_call_operand.hbm [shape: bf16[256,128], index: 5, kind: input, shape index: {}]   ;;  %s3884_s6 = inlined_call_operand.vmem [shape: f32[1,128], index: 6, kind: input, shape index: {}]   ;;  %s3885_s7 = inlined_call_operand.hbm [shape: bf16[128,128], index: 7, kind: input, shape index: {}]   ;;  %s3886_s8 = inlined_call_operand.vmem [shape: f32[1,128], index: 8, kind: input, shape index: {}]   ;;  %s3887_s9 = inlined_call_operand.hbm [shape: bf16[128,256], index: 9, kind: input, shape index: {}]   ;;  %s3888_s10 = inlined_call_operand.vmem [shape: f32[1,256], index: 10, kind: input, shape index: {}]   ;;  %s3889_s11 = inlined_call_operand.hbm [shape: bf16[256,512], index: 11, kind: input, shape index: {}]   ;;  %s3890_s12 = inlined_call_operand.vmem [shape: f32[1,512], index: 12, kind: input, shape index: {}]   ;;  %s3891_s13 = inlined_call_operand.hbm [shape: bf16[512,256], index: 13, kind: input, shape index: {}]   ;;  %s3892_s14 = inlined_call_operand.vmem [shape: f32[1,256], index: 14, kind: input, shape index: {}]   ;;  %s3893_s15 = inlined_call_operand.vmem [shape: f32[2,256], index: 15, kind: output, shape index: {0}]   ;;  %s3894_s16 = inlined_call_operand.vmem [shape: f32[2,128], index: 16, kind: output, shape index: {1}]   ;;  %s3895_s17 = inlined_call_operand.vmem [shape: f32[2,128], index: 17, kind: output, shape index: {2}]  }
   0x1   :  { %3902 = sst [smem:[#allocation17_spill]] %s3878_s0 }
   0x2   :  { %3903 = sst [smem:[#allocation18_spill]] %s3879_s1 }
   0x3   :  { %23 = vsyncpa [#allocation3], 0 }
   0x4   :  { %24 = vsyncpa [#allocation5], 0 }
   0x5   :  { %25 = vsyncpa [#allocation8], 0 }
   0x6   :  { %26 = vsyncpa [#allocation11], 0  ;;  %s3579_s24 = smov [#allocation4]   ;;  %s3417_s28 = scalar_lea.hbm %s3881_s3, 8192 }
   0x7   :  { %s48_s25 = sshll.u32 %s3579_s24, 4  ;;  %p3418_p0 = scmp.ne.s32.totalorder %s3881_s3, %s3417_s28  ;;  %s49_s25 = int_to_ptr.vmem [resolvable:$true] %s48_s25 }
   0x8   :  { %p3421_p1 = scmp.lt.u32.totalorder %s3417_s28, %s3881_s3 }
   0xa   :  { %p3423_p2 = pnand %p3421_p1, %p3418_p0 }
   0xc   :  { %3426 = shalt.err (!%p3423_p2)
}
   0xd   :  { %s3427_s19 = scalar_lea.vmem %s49_s25, 8192  ;;  %p3432_p4 = scmp.lt.s32.totalorder %s49_s25, %s49_s25 }
   0xe   :  { %p3428_p3 = scmp.ne.s32.totalorder %s49_s25, %s3427_s19  ;;  %p3433_p5 = scmp.lt.s32.totalorder %s3427_s19, %s3427_s19 }
  0x10   :  { %p3434_p6 = por %p3433_p5, %p3432_p4 }
  0x12   :  { %p3435_p7 = pnand %p3434_p6, %p3428_p3 }
  0x14   :  { %3438 = shalt.err (!%p3435_p7)
}
  0x15   :  { %s3897_s1 = smov 128   ;;  %s3899_s20 = smov 8  }
  0x16   :  { %54 = dma.hbm_to_vmem [thread:$0]  %s3881_s3, 8192, %s49_s25, [#allocation5], %s3897_s1, %s3897_s1, %s3899_s20  }
  0x17   :  { %s3582_s23 = smov [#allocation7]   ;;  %s3439_s28 = scalar_lea.hbm %s3885_s7, 1024 }
  0x18   :  { %s76_s24 = sshll.u32 %s3582_s23, 4  ;;  %p3440_p8 = scmp.ne.s32.totalorder %s3885_s7, %s3439_s28  ;;  %s77_s24 = int_to_ptr.vmem [resolvable:$true] %s76_s24 }
  0x19   :  { %p3443_p9 = scmp.lt.u32.totalorder %s3439_s28, %s3885_s7 }
  0x1b   :  { %p3445_p10 = pnand %p3443_p9, %p3440_p8 }
  0x1d   :  { %3448 = shalt.err (!%p3445_p10)
}
  0x1e   :  { %s3449_s19 = scalar_lea.vmem %s77_s24, 1024  ;;  %p3454_p12 = scmp.lt.s32.totalorder %s77_s24, %s77_s24 }
  0x1f   :  { %p3450_p11 = scmp.ne.s32.totalorder %s77_s24, %s3449_s19  ;;  %p3455_p13 = scmp.lt.s32.totalorder %s3449_s19, %s3449_s19 }
  0x21   :  { %p3456_p0 = por %p3455_p13, %p3454_p12 }
  0x23   :  { %p3457_p1 = pnand %p3456_p0, %p3450_p11 }
  0x25   :  { %3460 = shalt.err (!%p3457_p1)
}
  0x26   :  { %s3901_s3 = smov 64   ;;  %s3584_s25 = smov 4  }
  0x27   :  { %82 = dma.hbm_to_vmem [thread:$0]  %s3885_s7, 1024, %s77_s24, [#allocation8], %s3901_s3, %s3901_s3, %s3584_s25  }
  0x28   :  { %s3585_s23 = smov [#allocation10]   ;;  %s3586_s27 = smov [#allocation2]  }
  0x29   :  { %s104_s26 = sshll.u32 %s3585_s23, 4  ;;  %s34_s28 = sshll.u32 %s3586_s27, 4  ;;  %s105_s26 = int_to_ptr.vmem [resolvable:$true] %s104_s26  ;;  %s3715_s28 = int_to_ptr.vmem [resolvable:$true] %s34_s28 }
  0x2a   :  { %s3461_s30 = scalar_lea.hbm %s3889_s11, 8192 }
  0x2b   :  { %p3462_p2 = scmp.ne.s32.totalorder %s3889_s11, %s3461_s30  ;;  %p3465_p3 = scmp.lt.u32.totalorder %s3461_s30, %s3889_s11 }
  0x2d   :  { %p3467_p4 = pnand %p3465_p3, %p3462_p2 }
  0x2f   :  { %3470 = shalt.err (!%p3467_p4)
}
  0x30   :  { %s3471_s7 = scalar_lea.vmem %s105_s26, 8192  ;;  %p3476_p6 = scmp.lt.s32.totalorder %s105_s26, %s105_s26 }
  0x31   :  { %p3472_p5 = scmp.ne.s32.totalorder %s105_s26, %s3471_s7  ;;  %p3477_p7 = scmp.lt.s32.totalorder %s3471_s7, %s3471_s7 }
  0x33   :  { %p3478_p8 = por %p3477_p7, %p3476_p6 }
  0x35   :  { %p3479_p9 = pnand %p3478_p8, %p3472_p5 }
  0x37   :  { %3482 = shalt.err (!%p3479_p9)
}
  0x38   :  { %s3587_s24 = smov 256   ;;  %s3588_s21 = smov 16  }
  0x39   :  { %110 = dma.hbm_to_vmem [thread:$0]  %s3889_s11, 8192, %s105_s26, [#allocation11], %s3587_s24, %s3587_s24, %s3588_s21  }
  0x3a   :  { %s3904_s0 = sld [smem:[#allocation18_spill]] }
  0x40   :  { %s3483_s1 = scalar_lea.hbm %s3904_s0, 8192 }
  0x41   :  { %p3484_p10 = scmp.ne.s32.totalorder %s3904_s0, %s3483_s1  ;;  %p3487_p11 = scmp.lt.u32.totalorder %s3483_s1, %s3904_s0 }
  0x43   :  { %p3489_p12 = pnand %p3487_p11, %p3484_p10 }
  0x45   :  { %3492 = shalt.err (!%p3489_p12)
}
  0x46   :  { %s3493_s7 = scalar_lea.vmem %s3715_s28, 8192  ;;  %p3498_p0 = scmp.lt.s32.totalorder %s3715_s28, %s3715_s28 }
  0x47   :  { %p3494_p13 = scmp.ne.s32.totalorder %s3715_s28, %s3493_s7  ;;  %p3499_p1 = scmp.lt.s32.totalorder %s3493_s7, %s3493_s7 }
  0x49   :  { %p3500_p2 = por %p3499_p1, %p3498_p0 }
  0x4b   :  { %p3501_p3 = pnand %p3500_p2, %p3494_p13 }
  0x4d   :  { %3504 = shalt.err (!%p3501_p3)
}
  0x4e   :  { %40 = dma.hbm_to_vmem [thread:$0]  %s3904_s0, 8192, %s3715_s28, [#allocation3], %s3587_s24, %s3587_s24, %s3588_s21  }
  0x4f   :  { %s3589_s22 = smov [#allocation6]   ;;  %s3590_s27 = smov [#allocation9]  }
  0x50   :  { %s62_s23 = sshll.u32 %s3589_s22, 4  ;;  %s90_s29 = sshll.u32 %s3590_s27, 4  ;;  %s63_s23 = int_to_ptr.vmem [resolvable:$true] %s62_s23  ;;  %s3746_s29 = int_to_ptr.vmem [resolvable:$true] %s90_s29 }
  0x51   :  { %s3505_s30 = scalar_lea.hbm %s3883_s5, 2048 }
  0x52   :  { %p3506_p4 = scmp.ne.s32.totalorder %s3883_s5, %s3505_s30  ;;  %p3509_p5 = scmp.lt.u32.totalorder %s3505_s30, %s3883_s5 }
  0x54   :  { %p3511_p6 = pnand %p3509_p5, %p3506_p4 }
  0x56   :  { %3514 = shalt.err (!%p3511_p6)
}
  0x57   :  { %s3515_s28 = scalar_lea.vmem %s63_s23, 2048  ;;  %p3520_p8 = scmp.lt.s32.totalorder %s63_s23, %s63_s23 }
  0x58   :  { %p3516_p7 = scmp.ne.s32.totalorder %s63_s23, %s3515_s28  ;;  %p3521_p9 = scmp.lt.s32.totalorder %s3515_s28, %s3515_s28 }
  0x5a   :  { %p3522_p10 = por %p3521_p9, %p3520_p8 }
  0x5c   :  { %p3523_p11 = pnand %p3522_p10, %p3516_p7 }
  0x5e   :  { %3526 = shalt.err (!%p3523_p11)
}
  0x5f   :  { %s3905_s24 = smov 64   ;;  %s3527_s3 = scalar_lea.hbm %s3887_s9, 2048 }
  0x60   :  { %68 = dma.hbm_to_vmem [thread:$0]  %s3883_s5, 2048, %s63_s23, [#allocation5], %s3905_s24, %s3905_s24, %s3584_s25  }
  0x61   :  { %p3528_p12 = scmp.ne.s32.totalorder %s3887_s9, %s3527_s3  ;;  %p3531_p13 = scmp.lt.u32.totalorder %s3527_s3, %s3887_s9 }
  0x63   :  { %p3533_p0 = pnand %p3531_p13, %p3528_p12 }
  0x65   :  { %3536 = shalt.err (!%p3533_p0)
}
  0x66   :  { %s3537_s30 = scalar_lea.vmem %s3746_s29, 2048  ;;  %p3542_p2 = scmp.lt.s32.totalorder %s3746_s29, %s3746_s29 }
  0x67   :  { %p3538_p1 = scmp.ne.s32.totalorder %s3746_s29, %s3537_s30  ;;  %p3543_p3 = scmp.lt.s32.totalorder %s3537_s30, %s3537_s30 }
  0x69   :  { %p3544_p4 = por %p3543_p3, %p3542_p2 }
  0x6b   :  { %p3545_p5 = pnand %p3544_p4, %p3538_p1 }
  0x6d   :  { %3548 = shalt.err (!%p3545_p5)
}
  0x6e   :  { %s3906_s5 = smov 8   ;;  %s3907_s25 = smov 128  }
  0x6f   :  { %96 = dma.hbm_to_vmem [thread:$0]  %s3887_s9, 2048, %s3746_s29, [#allocation8], %s3907_s25, %s3907_s25, %s3906_s5  }
  0x70   :  { %s3591_s19 = smov [#allocation12]   ;;  %s3549_s21 = scalar_lea.hbm %s3891_s13, 8192 }
  0x71   :  { %s118_s7 = sshll.u32 %s3591_s19, 4  ;;  %p3550_p6 = scmp.ne.s32.totalorder %s3891_s13, %s3549_s21  ;;  %s119_s7 = int_to_ptr.vmem [resolvable:$true] %s118_s7 }
  0x72   :  { %p3553_p7 = scmp.lt.u32.totalorder %s3549_s21, %s3891_s13 }
  0x74   :  { %p3555_p8 = pnand %p3553_p7, %p3550_p6 }
  0x76   :  { %3558 = shalt.err (!%p3555_p8)
}
  0x77   :  { %s3559_s22 = scalar_lea.vmem %s119_s7, 8192  ;;  %p3564_p10 = scmp.lt.s32.totalorder %s119_s7, %s119_s7 }
  0x78   :  { %p3560_p9 = scmp.ne.s32.totalorder %s119_s7, %s3559_s22  ;;  %p3565_p11 = scmp.lt.s32.totalorder %s3559_s22, %s3559_s22 }
  0x7a   :  { %p3566_p12 = por %p3565_p11, %p3564_p10 }
  0x7c   :  { %p3567_p13 = pnand %p3566_p12, %p3560_p9 }
  0x7e   :  { %3570 = shalt.err (!%p3567_p13)
}
  0x7f   :  { %124 = dma.hbm_to_vmem [thread:$0]  %s3891_s13, 8192, %s119_s7, [#allocation11], %s3907_s25, %s3907_s25, %s3906_s5  }
  0x80   :  { %3571 = dma.done.wait [#allocation3], 8192  }
  0x81   :  { %3572 = vsyncadd [#allocation3], 4294959104 }
  0x82   :  { %3573 = dma.done.wait [#allocation5], 10240  }
  0x83   :  { %3574 = vsyncadd [#allocation5], 4294957056 }
  0x84   :  { %3575 = dma.done.wait [#allocation8], 3072  }
  0x85   :  { %3576 = vsyncadd [#allocation8], 4294964224 }
  0x86   :  { %3577 = dma.done.wait [#allocation11], 16384  }
  0x87   :  { %3578 = vsyncadd [#allocation11], 4294950912  ;;  %v2977_v0 = vld [vmem:[#allocation2 + $0x4] ss:$16 sps:$4 sm:$0xff]   ;;  %v2979_v1 = vld [vmem:[#allocation2] ss:$16 sps:$4 sm:$0xff]  }
  0x88   :  { %569 = vmatprep.subr.bf16.mxu0 %v2977_v0  ;;  %v2980_v2 = vld [vmem:[#allocation2 + $0x24] ss:$16 sps:$4 sm:$0xff]   ;;  %v2982_v3 = vld [vmem:[#allocation2 + $0x20] ss:$16 sps:$4 sm:$0xff]   ;;  %s3908_s1 = sld [smem:[#allocation17_spill]]  ;;  %vm3593_vm0 = vmmov 0  }
  0x89   :  { %570 = vmatpush1.bf16.msra.mxu0 %v2979_v1  ;;  %v2983_v4 = vld [vmem:[#allocation2 + $0x44] ss:$16 sps:$4 sm:$0xff]   ;;  %v2985_v5 = vld [vmem:[#allocation2 + $0x40] ss:$16 sps:$4 sm:$0xff]   ;;  %v3027_v35 = vld [vmem:[#allocation2 + $0xc] ss:$16 sps:$4 sm:$0xff]  }
  0x8a   :  { %571 = vmatprep.subr.bf16.mxu0 %v2980_v2  ;;  %v2986_v6 = vld [vmem:[#allocation2 + $0x64] ss:$16 sps:$4 sm:$0xff]   ;;  %v2988_v7 = vld [vmem:[#allocation2 + $0x60] ss:$16 sps:$4 sm:$0xff]   ;;  %v3025_v36 = vld [vmem:[#allocation2 + $0x8] ss:$16 sps:$4 sm:$0xff]  }
  0x8b   :  { %v2989_v8 = vld [vmem:[#allocation2 + $0x84] ss:$16 sps:$4 sm:$0xff]   ;;  %v2991_v9 = vld [vmem:[#allocation2 + $0x80] ss:$16 sps:$4 sm:$0xff]   ;;  %v3030_v38 = vld [vmem:[#allocation2 + $0x2c] ss:$16 sps:$4 sm:$0xff]  }
  0x8c   :  { %v2992_v10 = vld [vmem:[#allocation2 + $0xa4] ss:$16 sps:$4 sm:$0xff]   ;;  %v2994_v11 = vld [vmem:[#allocation2 + $0xa0] ss:$16 sps:$4 sm:$0xff]   ;;  %v3028_v39 = vld [vmem:[#allocation2 + $0x28] ss:$16 sps:$4 sm:$0xff]  }
  0x8d   :  { %572 = vmatpush1.bf16.msra.mxu0 %v2982_v3  ;;  %v2995_v12 = vld [vmem:[#allocation2 + $0xc4] ss:$16 sps:$4 sm:$0xff]   ;;  %v2997_v15 = vld [vmem:[#allocation2 + $0xc0] ss:$16 sps:$4 sm:$0xff]   ;;  %v3033_v40 = vld [vmem:[#allocation2 + $0x4c] ss:$16 sps:$4 sm:$0xff]  }
  0x8e   :  { %573 = vmatprep.subr.bf16.mxu0 %v2983_v4  ;;  %v2598_v13 = vld.sshfl [vmem:[%s3908_s1] sm:$0x33 pattern:$0x76325410]  ;;  %v2998_v16 = vld [vmem:[#allocation2 + $0xe4] ss:$16 sps:$4 sm:$0xff]  }
  0x8f   :  { %v158_v14 = vcombine.high %v2598_v13, %v2598_v13  ;;  %v3000_v18 = vld [vmem:[#allocation2 + $0xe0] ss:$16 sps:$4 sm:$0xff]   ;;  %v3001_v19 = vld [vmem:[#allocation2 + $0x104] ss:$16 sps:$4 sm:$0xff]   ;;  %v3801_v37 = vpack.c.bf16 %v2598_v13, %v2598_v13  ;;  %v3031_v41 = vld [vmem:[#allocation2 + $0x48] ss:$16 sps:$4 sm:$0xff]  }
  0x90   :  { %v3003_v20 = vld [vmem:[#allocation2 + $0x100] ss:$16 sps:$4 sm:$0xff]   ;;  %v3004_v21 = vld [vmem:[#allocation2 + $0x124] ss:$16 sps:$4 sm:$0xff]   ;;  %v3036_v42 = vld [vmem:[#allocation2 + $0x6c] ss:$16 sps:$4 sm:$0xff]  }
  0x91   :  { %574 = vmatpush1.bf16.msra.mxu0 %v2985_v5  ;;  %v162_v17 = vpack.c.bf16 %v158_v14, %v158_v14  ;;  %v3006_v22 = vld [vmem:[#allocation2 + $0x120] ss:$16 sps:$4 sm:$0xff]   ;;  %v3007_v23 = vld [vmem:[#allocation2 + $0x144] ss:$16 sps:$4 sm:$0xff]   ;;  %v3034_v43 = vld [vmem:[#allocation2 + $0x68] ss:$16 sps:$4 sm:$0xff]  }
  0x92   :  { %575 = vmatprep.subr.bf16.mxu0 %v2986_v6  ;;  %v3009_v24 = vld [vmem:[#allocation2 + $0x140] ss:$16 sps:$4 sm:$0xff]   ;;  %v3010_v25 = vld [vmem:[#allocation2 + $0x164] ss:$16 sps:$4 sm:$0xff]   ;;  %v3039_v44 = vld [vmem:[#allocation2 + $0x8c] ss:$16 sps:$4 sm:$0xff]  }
  0x93   :  { %601 = vmatprep.mubr.bf16.mxu0 %v162_v17  ;;  %v3012_v26 = vld [vmem:[#allocation2 + $0x160] ss:$16 sps:$4 sm:$0xff]   ;;  %v3013_v27 = vld [vmem:[#allocation2 + $0x184] ss:$16 sps:$4 sm:$0xff]   ;;  %v3037_v45 = vld [vmem:[#allocation2 + $0x88] ss:$16 sps:$4 sm:$0xff]  }
  0x94   :  { %v3015_v28 = vld [vmem:[#allocation2 + $0x180] ss:$16 sps:$4 sm:$0xff]   ;;  %v3016_v29 = vld [vmem:[#allocation2 + $0x1a4] ss:$16 sps:$4 sm:$0xff]   ;;  %v3042_v46 = vld [vmem:[#allocation2 + $0xac] ss:$16 sps:$4 sm:$0xff]  }
  0x95   :  { %576 = vmatpush1.bf16.msra.mxu0 %v2988_v7  ;;  %v3018_v30 = vld [vmem:[#allocation2 + $0x1a0] ss:$16 sps:$4 sm:$0xff]   ;;  %v3019_v31 = vld [vmem:[#allocation2 + $0x1c4] ss:$16 sps:$4 sm:$0xff]   ;;  %v3040_v47 = vld [vmem:[#allocation2 + $0xa8] ss:$16 sps:$4 sm:$0xff]  }
  0x96   :  { %577 = vmatprep.subr.bf16.mxu0 %v2989_v8  ;;  %v3021_v32 = vld [vmem:[#allocation2 + $0x1c0] ss:$16 sps:$4 sm:$0xff]   ;;  %v3022_v33 = vld [vmem:[#allocation2 + $0x1e4] ss:$16 sps:$4 sm:$0xff]   ;;  %v3045_v48 = vld [vmem:[#allocation2 + $0xcc] ss:$16 sps:$4 sm:$0xff]  }
  0x97   :  { %v3024_v34 = vld [vmem:[#allocation2 + $0x1e0] ss:$16 sps:$4 sm:$0xff]   ;;  %v3043_v49 = vld [vmem:[#allocation2 + $0xc8] ss:$16 sps:$4 sm:$0xff]   ;;  %v3048_v50 = vld [vmem:[#allocation2 + $0xec] ss:$16 sps:$4 sm:$0xff]  }
  0x98   :  { %v3046_v51 = vld [vmem:[#allocation2 + $0xe8] ss:$16 sps:$4 sm:$0xff]   ;;  %v3051_v52 = vld [vmem:[#allocation2 + $0x10c] ss:$16 sps:$4 sm:$0xff]  }
  0x99   :  { %578 = vmatpush1.bf16.msra.mxu0 %v2991_v9  ;;  %v3049_v53 = vld [vmem:[#allocation2 + $0x108] ss:$16 sps:$4 sm:$0xff]   ;;  %v3054_v54 = vld [vmem:[#allocation2 + $0x12c] ss:$16 sps:$4 sm:$0xff]  }
  0x9a   :  { %579 = vmatprep.subr.bf16.mxu0 %v2992_v10  ;;  %v3052_v55 = vld [vmem:[#allocation2 + $0x128] ss:$16 sps:$4 sm:$0xff]   ;;  %v3057_v56 = vld [vmem:[#allocation2 + $0x14c] ss:$16 sps:$4 sm:$0xff]  }
  0x9b   :  { %v3055_v57 = vld [vmem:[#allocation2 + $0x148] ss:$16 sps:$4 sm:$0xff]   ;;  %v3060_v58 = vld [vmem:[#allocation2 + $0x16c] ss:$16 sps:$4 sm:$0xff]  }
  0x9c   :  { %v3058_v59 = vld [vmem:[#allocation2 + $0x168] ss:$16 sps:$4 sm:$0xff]   ;;  %v3063_v60 = vld [vmem:[#allocation2 + $0x18c] ss:$16 sps:$4 sm:$0xff]  }
  0x9d   :  { %580 = vmatpush1.bf16.msra.mxu0 %v2994_v11  ;;  %v3061_v61 = vld [vmem:[#allocation2 + $0x188] ss:$16 sps:$4 sm:$0xff]   ;;  %v3066_v62 = vld [vmem:[#allocation2 + $0x1ac] ss:$16 sps:$4 sm:$0xff]  }
  0x9e   :  { %581 = vmatprep.subr.bf16.mxu0 %v2995_v12  ;;  %v3064_v63 = vld [vmem:[#allocation2 + $0x1a8] ss:$16 sps:$4 sm:$0xff]   ;;  %v3069_v0 = vld [vmem:[#allocation2 + $0x1cc] ss:$16 sps:$4 sm:$0xff]  }
  0x9f   :  { %v3067_v1 = vld [vmem:[#allocation2 + $0x1c8] ss:$16 sps:$4 sm:$0xff]   ;;  %v3072_v2 = vld [vmem:[#allocation2 + $0x1ec] ss:$16 sps:$4 sm:$0xff]  }
  0xa0   :  { %v3070_v3 = vld [vmem:[#allocation2 + $0x1e8] ss:$16 sps:$4 sm:$0xff]   ;;  %v3075_v4 = vld [vmem:[#allocation4 + $0x4] ss:$8 sps:$4 sm:$0xff]   ;;  %v3078_v6 = vld [vmem:[#allocation4 + $0x14] ss:$8 sps:$4 sm:$0xff]  }
  0xa1   :  { %582 = vmatpush1.bf16.msra.mxu0 %v2997_v15  ;;  %v3073_v5 = vld [vmem:[#allocation4] ss:$8 sps:$4 sm:$0xff]   ;;  %v3076_v7 = vld [vmem:[#allocation4 + $0x10] ss:$8 sps:$4 sm:$0xff]   ;;  %v3081_v8 = vld [vmem:[#allocation4 + $0x24] ss:$8 sps:$4 sm:$0xff]  }
  0xa2   :  { %583 = vmatprep.subr.bf16.mxu0 %v2998_v16  ;;  %v3079_v9 = vld [vmem:[#allocation4 + $0x20] ss:$8 sps:$4 sm:$0xff]   ;;  %v3084_v10 = vld [vmem:[#allocation4 + $0x34] ss:$8 sps:$4 sm:$0xff]   ;;  %v3082_v11 = vld [vmem:[#allocation4 + $0x30] ss:$8 sps:$4 sm:$0xff]  }
  0xa3   :  { %v3087_v12 = vld [vmem:[#allocation4 + $0x44] ss:$8 sps:$4 sm:$0xff]   ;;  %v3085_v13 = vld [vmem:[#allocation4 + $0x40] ss:$8 sps:$4 sm:$0xff]   ;;  %v3090_v14 = vld [vmem:[#allocation4 + $0x54] ss:$8 sps:$4 sm:$0xff]  }
  0xa4   :  { %v3088_v15 = vld [vmem:[#allocation4 + $0x50] ss:$8 sps:$4 sm:$0xff]   ;;  %v3093_v16 = vld [vmem:[#allocation4 + $0x64] ss:$8 sps:$4 sm:$0xff]  }
  0xa5   :  { %584 = vmatpush1.bf16.msra.mxu0 %v3000_v18  ;;  %v3096_v18 = vld [vmem:[#allocation4 + $0x74] ss:$8 sps:$4 sm:$0xff]  }
  0xa6   :  { %585 = vmatprep.subr.bf16.mxu0 %v3001_v19  ;;  %v3094_v19 = vld [vmem:[#allocation4 + $0x70] ss:$8 sps:$4 sm:$0xff]  }
  0xa9   :  { %586 = vmatpush1.bf16.msra.mxu0 %v3003_v20  ;;  %v3099_v20 = vld [vmem:[#allocation4 + $0x84] ss:$8 sps:$4 sm:$0xff]  }
  0xaa   :  { %587 = vmatprep.subr.bf16.mxu0 %v3004_v21  ;;  %v3097_v21 = vld [vmem:[#allocation4 + $0x80] ss:$8 sps:$4 sm:$0xff]  }
  0xad   :  { %588 = vmatpush1.bf16.msra.mxu0 %v3006_v22  ;;  %v3102_v22 = vld [vmem:[#allocation4 + $0x94] ss:$8 sps:$4 sm:$0xff]  }
  0xae   :  { %589 = vmatprep.subr.bf16.mxu0 %v3007_v23  ;;  %v3100_v23 = vld [vmem:[#allocation4 + $0x90] ss:$8 sps:$4 sm:$0xff]  }
  0xb1   :  { %590 = vmatpush1.bf16.msra.mxu0 %v3009_v24  ;;  %v3105_v24 = vld [vmem:[#allocation4 + $0xa4] ss:$8 sps:$4 sm:$0xff]  }
  0xb2   :  { %591 = vmatprep.subr.bf16.mxu0 %v3010_v25  ;;  %v3103_v25 = vld [vmem:[#allocation4 + $0xa0] ss:$8 sps:$4 sm:$0xff]  }
  0xb5   :  { %592 = vmatpush1.bf16.msra.mxu0 %v3012_v26  ;;  %v3108_v26 = vld [vmem:[#allocation4 + $0xb4] ss:$8 sps:$4 sm:$0xff]  }
  0xb6   :  { %593 = vmatprep.subr.bf16.mxu0 %v3013_v27  ;;  %v3106_v27 = vld [vmem:[#allocation4 + $0xb0] ss:$8 sps:$4 sm:$0xff]  }
  0xb9   :  { %594 = vmatpush1.bf16.msra.mxu0 %v3015_v28  ;;  %v3111_v28 = vld [vmem:[#allocation4 + $0xc4] ss:$8 sps:$4 sm:$0xff]  }
  0xba   :  { %595 = vmatprep.subr.bf16.mxu0 %v3016_v29  ;;  %v3109_v29 = vld [vmem:[#allocation4 + $0xc0] ss:$8 sps:$4 sm:$0xff]  }
  0xbd   :  { %596 = vmatpush1.bf16.msra.mxu0 %v3018_v30  ;;  %v3114_v30 = vld [vmem:[#allocation4 + $0xd4] ss:$8 sps:$4 sm:$0xff]  }
  0xbe   :  { %597 = vmatprep.subr.bf16.mxu0 %v3019_v31  ;;  %v3112_v31 = vld [vmem:[#allocation4 + $0xd0] ss:$8 sps:$4 sm:$0xff]  }
  0xc1   :  { %598 = vmatpush1.bf16.msra.mxu0 %v3021_v32  ;;  %v3117_v32 = vld [vmem:[#allocation4 + $0xe4] ss:$8 sps:$4 sm:$0xff]  }
  0xc2   :  { %599 = vmatprep.subr.bf16.mxu0 %v3022_v33  ;;  %v3115_v33 = vld [vmem:[#allocation4 + $0xe0] ss:$8 sps:$4 sm:$0xff]  }
  0xc5   :  { %600 = vmatpush1.bf16.msra.mxu0 %v3024_v34  ;;  %v3120_v34 = vld [vmem:[#allocation4 + $0xf4] ss:$8 sps:$4 sm:$0xff]  }
  0xc6   :  { %610 = vmatprep.subr.bf16.mxu0 %v3027_v35  ;;  %v3118_v35 = vld [vmem:[#allocation4 + $0xf0] ss:$8 sps:$4 sm:$0xff]  }
  0xc8   :  { %602 = vmatmul.mubr.bf16.vlgmr.msra.gmra.mrb[0].mxu0 %v3801_v37 }
  0xc9   :  { %611 = vmatpush1.bf16.msra.mxu0 %v3025_v36  ;;  %642 = vmatprep.mubr.bf16.mxu0 %v162_v17  ;;  %v3091_v17 = vld [vmem:[#allocation4 + $0x60] ss:$8 sps:$4 sm:$0xff]   ;;  %v3123_v36 = vld [vmem:[#allocation4 + $0x104] ss:$8 sps:$4 sm:$0xff]  }
  0xca   :  { %612 = vmatprep.subr.bf16.mxu0 %v3030_v38  ;;  %v3170_v38 = vld [vmem:[#allocation6] sm:$0xff]  }
  0xcd   :  { %613 = vmatpush1.bf16.msra.mxu0 %v3028_v39  ;;  %v3171_v39 = vld [vmem:[#allocation6 + $0x48] sm:$0xff]  }
  0xce   :  { %614 = vmatprep.subr.bf16.mxu0 %v3033_v40  ;;  %v3172_v40 = vld [vmem:[#allocation6 + $0x8] sm:$0xff]  }
  0xd1   :  { %615 = vmatpush1.bf16.msra.mxu0 %v3031_v41  ;;  %v3173_v41 = vld [vmem:[#allocation6 + $0x50] sm:$0xff]  }
  0xd2   :  { %616 = vmatprep.subr.bf16.mxu0 %v3036_v42  ;;  %v3174_v42 = vld [vmem:[#allocation6 + $0x10] sm:$0xff]  }
  0xd5   :  { %617 = vmatpush1.bf16.msra.mxu0 %v3034_v43  ;;  %v3175_v43 = vld [vmem:[#allocation6 + $0x58] sm:$0xff]  }
  0xd6   :  { %618 = vmatprep.subr.bf16.mxu0 %v3039_v44  ;;  %v3176_v44 = vld [vmem:[#allocation6 + $0x18] sm:$0xff]  }
  0xd9   :  { %619 = vmatpush1.bf16.msra.mxu0 %v3037_v45  ;;  %v3177_v45 = vld [vmem:[#allocation6 + $0x60] sm:$0xff]  }
  0xda   :  { %620 = vmatprep.subr.bf16.mxu0 %v3042_v46  ;;  %v3178_v46 = vld [vmem:[#allocation6 + $0x20] sm:$0xff]  }
  0xdd   :  { %621 = vmatpush1.bf16.msra.mxu0 %v3040_v47  ;;  %v3179_v47 = vld [vmem:[#allocation6 + $0x68] sm:$0xff]  }
  0xde   :  { %622 = vmatprep.subr.bf16.mxu0 %v3045_v48  ;;  %v3180_v48 = vld [vmem:[#allocation6 + $0x28] sm:$0xff]  }
  0xe1   :  { %623 = vmatpush1.bf16.msra.mxu0 %v3043_v49  ;;  %v229_v49 = vlaneseq }
  0xe2   :  { %624 = vmatprep.subr.bf16.mxu0 %v3048_v50 }
  0xe3   :  { %v3805_v50 = vshrl.u32 %v229_v49, 7  ;;  %v3183_v49 = vld [vmem:[#allocation6 + $0x78] sm:$0xff]  }
  0xe5   :  { %625 = vmatpush1.bf16.msra.mxu0 %v3046_v51  ;;  %v3808_v51 = vsub.s32 0, %v3805_v50 }
  0xe6   :  { %626 = vmatprep.subr.bf16.mxu0 %v3051_v52  ;;  %v3813_v52 = vld [vmem:[%s3880_s2] sm:$0xf] }
  0xe9   :  { %627 = vmatpush1.bf16.msra.mxu0 %v3049_v53  ;;  %v3816_v53 = vsub.s32 1, %v3805_v50 }
  0xea   :  { %628 = vmatprep.subr.bf16.mxu0 %v3054_v54  ;;  %v232_v54 = vrot.slane %v3813_v52, %v3808_v51 }
  0xed   :  { %629 = vmatpush1.bf16.msra.mxu0 %v3052_v55  ;;  %v236_v55 = vrot.slane %v3813_v52, %v3816_v53 }
  0xee   :  { %630 = vmatprep.subr.bf16.mxu0 %v3057_v56 }
  0xf1   :  { %631 = vmatpush1.bf16.msra.mxu0 %v3055_v57 }
  0xf2   :  { %632 = vmatprep.subr.bf16.mxu0 %v3060_v58 }
  0xf5   :  { %633 = vmatpush1.bf16.msra.mxu0 %v3058_v59 }
  0xf6   :  { %634 = vmatprep.subr.bf16.mxu0 %v3063_v60 }
  0xf9   :  { %635 = vmatpush1.bf16.msra.mxu0 %v3061_v61 }
  0xfa   :  { %636 = vmatprep.subr.bf16.mxu0 %v3066_v62 }
  0xfd   :  { %637 = vmatpush1.bf16.msra.mxu0 %v3064_v63 }
  0xfe   :  { %638 = vmatprep.subr.bf16.mxu0 %v3069_v0 }
 0x101   :  { %639 = vmatpush1.bf16.msra.mxu0 %v3067_v1 }
 0x102   :  { %640 = vmatprep.subr.bf16.mxu0 %v3072_v2  ;;  %v3121_v2 = vld [vmem:[#allocation4 + $0x100] ss:$8 sps:$4 sm:$0xff]  }
 0x105   :  { %641 = vmatpush1.bf16.msra.mxu0 %v3070_v3  ;;  %v3126_v3 = vld [vmem:[#allocation4 + $0x114] ss:$8 sps:$4 sm:$0xff]  }
 0x106   :  { %1055 = vmatprep.subr.bf16.mxu0 %v3075_v4  ;;  %v3124_v4 = vld [vmem:[#allocation4 + $0x110] ss:$8 sps:$4 sm:$0xff]  }
 0x108   :  { %643 = vmatmul.mubr.bf16.vlgmr.msra.gmra.mrb[4].mxu0 %v3801_v37  ;;  %v3169_v37 = vld [vmem:[#allocation6 + $0x40] sm:$0xff]  }
 0x109   :  { %1056 = vmatpush1.bf16.msra.mxu0 %v3073_v5  ;;  %2898 = vmatprep.subr.bf16.mxu1 %v3169_v37  ;;  %v3129_v5 = vld [vmem:[#allocation4 + $0x124] ss:$8 sps:$4 sm:$0xff]  }
 0x10a   :  { %1057 = vmatprep.subr.bf16.mxu0 %v3078_v6  ;;  %2899 = vmatpush3.bf16.msra.mxu1 %v3170_v38  ;;  %v3127_v6 = vld [vmem:[#allocation4 + $0x120] ss:$8 sps:$4 sm:$0xff]  }
 0x10b   :  { %2900 = vmatprep.subr.bf16.mxu1 %v3171_v39 }
 0x10d   :  { %1058 = vmatpush1.bf16.msra.mxu0 %v3076_v7  ;;  %v3132_v7 = vld [vmem:[#allocation4 + $0x134] ss:$8 sps:$4 sm:$0xff]  }
 0x10e   :  { %1059 = vmatprep.subr.bf16.mxu0 %v3081_v8  ;;  %2901 = vmatpush3.bf16.msra.mxu1 %v3172_v40  ;;  %v3130_v8 = vld [vmem:[#allocation4 + $0x130] ss:$8 sps:$4 sm:$0xff]  }
 0x10f   :  { %2902 = vmatprep.subr.bf16.mxu1 %v3173_v41  ;;  %v3166_v41 = vld [vmem:[#allocation4 + $0x1f0] ss:$8 sps:$4 sm:$0xff]  }
 0x111   :  { %1060 = vmatpush1.bf16.msra.mxu0 %v3079_v9  ;;  %v3135_v9 = vld [vmem:[#allocation4 + $0x144] ss:$8 sps:$4 sm:$0xff]  }
 0x112   :  { %1061 = vmatprep.subr.bf16.mxu0 %v3084_v10  ;;  %2903 = vmatpush3.bf16.msra.mxu1 %v3174_v42  ;;  %v3133_v10 = vld [vmem:[#allocation4 + $0x140] ss:$8 sps:$4 sm:$0xff]  }
 0x113   :  { %2904 = vmatprep.subr.bf16.mxu1 %v3175_v43 }
 0x115   :  { %1062 = vmatpush1.bf16.msra.mxu0 %v3082_v11  ;;  %v3138_v11 = vld [vmem:[#allocation4 + $0x154] ss:$8 sps:$4 sm:$0xff]  }
 0x116   :  { %1063 = vmatprep.subr.bf16.mxu0 %v3087_v12  ;;  %2905 = vmatpush3.bf16.msra.mxu1 %v3176_v44  ;;  %v3136_v12 = vld [vmem:[#allocation4 + $0x150] ss:$8 sps:$4 sm:$0xff]  }
 0x117   :  { %2906 = vmatprep.subr.bf16.mxu1 %v3177_v45 }
 0x119   :  { %1064 = vmatpush1.bf16.msra.mxu0 %v3085_v13  ;;  %v3141_v13 = vld [vmem:[#allocation4 + $0x164] ss:$8 sps:$4 sm:$0xff]  }
 0x11a   :  { %1065 = vmatprep.subr.bf16.mxu0 %v3090_v14  ;;  %2907 = vmatpush3.bf16.msra.mxu1 %v3178_v46  ;;  %v3139_v14 = vld [vmem:[#allocation4 + $0x160] ss:$8 sps:$4 sm:$0xff]  }
 0x11b   :  { %2908 = vmatprep.subr.bf16.mxu1 %v3179_v47  ;;  %v3181_v47 = vld [vmem:[#allocation6 + $0x70] sm:$0xff]  }
 0x11d   :  { %1066 = vmatpush1.bf16.msra.mxu0 %v3088_v15  ;;  %v3144_v15 = vld [vmem:[#allocation4 + $0x174] ss:$8 sps:$4 sm:$0xff]  }
 0x11e   :  { %1067 = vmatprep.subr.bf16.mxu0 %v3093_v16  ;;  %2909 = vmatpush3.bf16.msra.mxu1 %v3180_v48  ;;  %v3142_v16 = vld [vmem:[#allocation4 + $0x170] ss:$8 sps:$4 sm:$0xff]  }
 0x11f   :  { %v3182_v48 = vld [vmem:[#allocation6 + $0x30] sm:$0xff]   ;;  %2910 = vmatprep.subr.bf16.mxu1 %v3181_v47  ;;  %v3240_v47 = vld [vmem:[#allocation10 + $0x6c] ss:$16 sps:$4 sm:$0xff]  }
 0x121   :  { %1068 = vmatpush1.bf16.msra.mxu0 %v3091_v17  ;;  %v3147_v17 = vld [vmem:[#allocation4 + $0x184] ss:$8 sps:$4 sm:$0xff]  }
 0x122   :  { %1069 = vmatprep.subr.bf16.mxu0 %v3096_v18  ;;  %v3145_v18 = vld [vmem:[#allocation4 + $0x180] ss:$8 sps:$4 sm:$0xff]   ;;  %2911 = vmatpush3.bf16.msra.mxu1 %v3182_v48 }
 0x123   :  { %2912 = vmatprep.subr.bf16.mxu1 %v3183_v49  ;;  %v3238_v48 = vld [vmem:[#allocation10 + $0x68] ss:$16 sps:$4 sm:$0xff]   ;;  %v3246_v49 = vld [vmem:[#allocation10 + $0x8c] ss:$16 sps:$4 sm:$0xff]  }
 0x125   :  { %1070 = vmatpush1.bf16.msra.mxu0 %v3094_v19  ;;  %v3150_v19 = vld [vmem:[#allocation4 + $0x194] ss:$8 sps:$4 sm:$0xff]  }
 0x126   :  { %1071 = vmatprep.subr.bf16.mxu0 %v3099_v20  ;;  %v3148_v20 = vld [vmem:[#allocation4 + $0x190] ss:$8 sps:$4 sm:$0xff]  }
 0x129   :  { %1072 = vmatpush1.bf16.msra.mxu0 %v3097_v21  ;;  %v3153_v21 = vld [vmem:[#allocation4 + $0x1a4] ss:$8 sps:$4 sm:$0xff]  }
 0x12a   :  { %1073 = vmatprep.subr.bf16.mxu0 %v3102_v22  ;;  %v3151_v22 = vld [vmem:[#allocation4 + $0x1a0] ss:$8 sps:$4 sm:$0xff]  }
 0x12d   :  { %1074 = vmatpush1.bf16.msra.mxu0 %v3100_v23  ;;  %v3156_v23 = vld [vmem:[#allocation4 + $0x1b4] ss:$8 sps:$4 sm:$0xff]  }
 0x12e   :  { %1075 = vmatprep.subr.bf16.mxu0 %v3105_v24  ;;  %v3154_v24 = vld [vmem:[#allocation4 + $0x1b0] ss:$8 sps:$4 sm:$0xff]  }
 0x131   :  { %1076 = vmatpush1.bf16.msra.mxu0 %v3103_v25  ;;  %v3159_v25 = vld [vmem:[#allocation4 + $0x1c4] ss:$8 sps:$4 sm:$0xff]  }
 0x132   :  { %1077 = vmatprep.subr.bf16.mxu0 %v3108_v26  ;;  %v3157_v26 = vld [vmem:[#allocation4 + $0x1c0] ss:$8 sps:$4 sm:$0xff]  }
 0x135   :  { %1078 = vmatpush1.bf16.msra.mxu0 %v3106_v27  ;;  %v3162_v27 = vld [vmem:[#allocation4 + $0x1d4] ss:$8 sps:$4 sm:$0xff]  }
 0x136   :  { %1079 = vmatprep.subr.bf16.mxu0 %v3111_v28  ;;  %v239_v28 = vsub.s32 2, %v3805_v50 }
 0x139   :  { %1080 = vmatpush1.bf16.msra.mxu0 %v3109_v29  ;;  %v3160_v29 = vld [vmem:[#allocation4 + $0x1d0] ss:$8 sps:$4 sm:$0xff]  }
 0x13a   :  { %1081 = vmatprep.subr.bf16.mxu0 %v3114_v30  ;;  %v243_v30 = vsub.s32 3, %v3805_v50  ;;  %v2146_v50 = vld [vmem:[%s3892_s14] sm:$0x3] }
 0x13d   :  { %1082 = vmatpush1.bf16.msra.mxu0 %v3112_v31  ;;  %v3165_v31 = vld [vmem:[#allocation4 + $0x1e4] ss:$8 sps:$4 sm:$0xff]  }
 0x13e   :  { %1083 = vmatprep.subr.bf16.mxu0 %v3117_v32  ;;  %v240_v32 = vrot.slane %v3813_v52, %v239_v28 }
 0x141   :  { %1084 = vmatpush1.bf16.msra.mxu0 %v3115_v33  ;;  %v244_v33 = vrot.slane %v3813_v52, %v243_v30  ;;  %v3184_v52 = vld [vmem:[#allocation6 + $0x38] sm:$0xff]  }
 0x142   :  { %1085 = vmatprep.subr.bf16.mxu0 %v3120_v34  ;;  %v3163_v34 = vld [vmem:[#allocation4 + $0x1e0] ss:$8 sps:$4 sm:$0xff]   ;;  %2913 = vmatpush3.bf16.msra.mxu1 %v3184_v52 }
 0x143   :  { %v3244_v52 = vld [vmem:[#allocation10 + $0x88] ss:$16 sps:$4 sm:$0xff]  }
 0x145   :  { %1086 = vmatpush1.bf16.msra.mxu0 %v3118_v35  ;;  %v3168_v35 = vld [vmem:[#allocation4 + $0x1f4] ss:$8 sps:$4 sm:$0xff]  }
 0x146   :  { %1096 = vmatprep.subr.bf16.mxu0 %v3123_v36 }
 0x19b   :  { %v603_v56 = vpop.f32.mrb[0].mxu0 }
 0x19c   :  { %v604_v57 = vadd.f32 %v603_v56, %v232_v54  ;;  %v605_v58 = vpop.f32.mrb[1].mxu0  ;;  %v3592_v54 = vmov 0.0  }
 0x19d   :  { %v606_v59 = vadd.f32 %v605_v58, %v236_v55  ;;  %v607_v60 = vpop.f32.mrb[2].mxu0  ;;  %2929 = vmatprep.subr.bf16.mxu1 %v3592_v54  ;;  %v723_v55 = vld [vmem:[%s3882_s4] sm:$0x3] }
 0x19e   :  { %v651_v61 = vmax.f32 %v604_v57, 0.0  ;;  %v608_v62 = vpop.f32.mrb[3].mxu0  ;;  %v728_v56 = vrot.slane %v723_v55, %v3808_v51  ;;  %v732_v57 = vrot.slane %v723_v55, %v3816_v53  ;;  %v3250_v55 = vld [vmem:[#allocation10 + $0xa8] ss:$16 sps:$4 sm:$0xff]  }
 0x19f   :  { %v652_v63 = vmax.f32 %v606_v59, 0.0 }
 0x1a0   :  { %v655_v0 = vpack.c.bf16 %v651_v61, %v651_v61 }
 0x1a1   :  { %v656_v1 = vpack.c.bf16 %v652_v63, %v652_v63 }
 0x1a3   :  { %1087 = vmatprep.mubr.bf16.mxu0 %v656_v1 }
 0x1a4   :  { %1088 = vmatmul.mubr.bf16.vlgmr.msra.gmra.mrb[8].mxu0 %v655_v0 }
 0x1a5   :  { %1097 = vmatpush1.bf16.msra.mxu0 %v3121_v2 }
 0x1a6   :  { %1098 = vmatprep.subr.bf16.mxu0 %v3126_v3  ;;  %v3185_v3 = vld [vmem:[#allocation7] sm:$0xff]  }
 0x1a9   :  { %1099 = vmatpush1.bf16.msra.mxu0 %v3124_v4 }
 0x1aa   :  { %1100 = vmatprep.subr.bf16.mxu0 %v3129_v5  ;;  %v3186_v5 = vld [vmem:[#allocation7 + $0x8] sm:$0xff]  }
 0x1ad   :  { %1101 = vmatpush1.bf16.msra.mxu0 %v3127_v6  ;;  %v3187_v6 = vld [vmem:[#allocation7 + $0x10] sm:$0xff]  }
 0x1ae   :  { %1102 = vmatprep.subr.bf16.mxu0 %v3132_v7  ;;  %v3188_v7 = vld [vmem:[#allocation7 + $0x18] sm:$0xff]  }
 0x1b1   :  { %1103 = vmatpush1.bf16.msra.mxu0 %v3130_v8  ;;  %v3189_v8 = vld [vmem:[#allocation7 + $0x20] sm:$0xff]  }
 0x1b2   :  { %1104 = vmatprep.subr.bf16.mxu0 %v3135_v9  ;;  %v3190_v9 = vld [vmem:[#allocation7 + $0x28] sm:$0xff]  }
 0x1b5   :  { %1105 = vmatpush1.bf16.msra.mxu0 %v3133_v10  ;;  %v3191_v10 = vld [vmem:[#allocation7 + $0x30] sm:$0xff]  }
 0x1b6   :  { %1106 = vmatprep.subr.bf16.mxu0 %v3138_v11  ;;  %v3192_v11 = vld [vmem:[#allocation7 + $0x38] sm:$0xff]  }
 0x1b9   :  { %1107 = vmatpush1.bf16.msra.mxu0 %v3136_v12  ;;  %v3195_v12 = vld [vmem:[#allocation9 + $0x4] ss:$8 sps:$4 sm:$0xff]  }
 0x1ba   :  { %1108 = vmatprep.subr.bf16.mxu0 %v3141_v13 }
 0x1bd   :  { %1109 = vmatpush1.bf16.msra.mxu0 %v3139_v14  ;;  %v2727_v14 = vld [vmem:[%s3884_s6] ss:$0 sm:$0xff] }
 0x1be   :  { %1110 = vmatprep.subr.bf16.mxu0 %v3144_v15 }
 0x1c1   :  { %1111 = vmatpush1.bf16.msra.mxu0 %v3142_v16 }
 0x1c2   :  { %1112 = vmatprep.subr.bf16.mxu0 %v3147_v17 }
 0x1c5   :  { %1113 = vmatpush1.bf16.msra.mxu0 %v3145_v18 }
 0x1c6   :  { %1114 = vmatprep.subr.bf16.mxu0 %v3150_v19 }
 0x1c9   :  { %1115 = vmatpush1.bf16.msra.mxu0 %v3148_v20 }
 0x1ca   :  { %1116 = vmatprep.subr.bf16.mxu0 %v3153_v21  ;;  %v3193_v21 = vld [vmem:[#allocation9] ss:$8 sps:$4 sm:$0xff]  }
 0x1cd   :  { %1117 = vmatpush1.bf16.msra.mxu0 %v3151_v22 }
 0x1ce   :  { %1118 = vmatprep.subr.bf16.mxu0 %v3156_v23  ;;  %v3198_v23 = vld [vmem:[#allocation9 + $0x14] ss:$8 sps:$4 sm:$0xff]  }
 0x1d1   :  { %1119 = vmatpush1.bf16.msra.mxu0 %v3154_v24  ;;  %v3196_v24 = vld [vmem:[#allocation9 + $0x10] ss:$8 sps:$4 sm:$0xff]  }
 0x1d2   :  { %1120 = vmatprep.subr.bf16.mxu0 %v3159_v25  ;;  %v3201_v25 = vld [vmem:[#allocation9 + $0x24] ss:$8 sps:$4 sm:$0xff]  }
 0x1d5   :  { %1121 = vmatpush1.bf16.msra.mxu0 %v3157_v26  ;;  %v3199_v26 = vld [vmem:[#allocation9 + $0x20] ss:$8 sps:$4 sm:$0xff]  }
 0x1d6   :  { %1122 = vmatprep.subr.bf16.mxu0 %v3162_v27  ;;  %v3204_v27 = vld [vmem:[#allocation9 + $0x34] ss:$8 sps:$4 sm:$0xff]  }
 0x1d9   :  { %1123 = vmatpush1.bf16.msra.mxu0 %v3160_v29  ;;  %v3202_v29 = vld [vmem:[#allocation9 + $0x30] ss:$8 sps:$4 sm:$0xff]  }
 0x1da   :  { %1124 = vmatprep.subr.bf16.mxu0 %v3165_v31  ;;  %v3207_v31 = vld [vmem:[#allocation9 + $0x44] ss:$8 sps:$4 sm:$0xff]  }
 0x1db   :  { %v644_v36 = vpop.f32.mrb[4].mxu0 }
 0x1dc   :  { %v645_v37 = vadd.f32 %v644_v36, %v240_v32  ;;  %v646_v38 = vpop.f32.mrb[5].mxu0  ;;  %v3205_v32 = vld [vmem:[#allocation9 + $0x40] ss:$8 sps:$4 sm:$0xff]  }
 0x1dd   :  { %v647_v39 = vadd.f32 %v646_v38, %v244_v33  ;;  %v648_v40 = vpop.f32.mrb[6].mxu0  ;;  %1125 = vmatpush1.bf16.msra.mxu0 %v3163_v34  ;;  %v3210_v33 = vld [vmem:[#allocation9 + $0x54] ss:$8 sps:$4 sm:$0xff]   ;;  %v3208_v34 = vld [vmem:[#allocation9 + $0x50] ss:$8 sps:$4 sm:$0xff]  }
 0x1de   :  { %v653_v42 = vmax.f32 %v645_v37, 0.0  ;;  %v649_v43 = vpop.f32.mrb[7].mxu0  ;;  %1126 = vmatprep.subr.bf16.mxu0 %v3168_v35  ;;  %v3213_v35 = vld [vmem:[#allocation9 + $0x64] ss:$8 sps:$4 sm:$0xff]   ;;  %v3211_v36 = vld [vmem:[#allocation9 + $0x60] ss:$8 sps:$4 sm:$0xff]  }
 0x1df   :  { %v654_v44 = vmax.f32 %v647_v39, 0.0  ;;  %v3216_v37 = vld [vmem:[#allocation9 + $0x74] ss:$8 sps:$4 sm:$0xff]   ;;  %v3214_v38 = vld [vmem:[#allocation9 + $0x70] ss:$8 sps:$4 sm:$0xff]   ;;  %v3594_v39 = vmov 0  }
 0x1e0   :  { %v657_v46 = vpack.c.bf16 %v653_v42, %v653_v42  ;;  %v3219_v40 = vld [vmem:[#allocation10 + $0x4] ss:$16 sps:$4 sm:$0xff]   ;;  %v3222_v42 = vld [vmem:[#allocation10 + $0xc] ss:$16 sps:$4 sm:$0xff]  }
 0x1e1   :  { %v658_v45 = vpack.c.bf16 %v654_v44, %v654_v44  ;;  %1127 = vmatpush1.bf16.msra.mxu0 %v3166_v41  ;;  %v3220_v41 = vld [vmem:[#allocation10 + $0x8] ss:$16 sps:$4 sm:$0xff]   ;;  %v3228_v43 = vld [vmem:[#allocation10 + $0x2c] ss:$16 sps:$4 sm:$0xff]  }
 0x1e2   :  { %2033 = vmatprep.subr.bf16.mxu0 %v3222_v42  ;;  %v3226_v44 = vld [vmem:[#allocation10 + $0x28] ss:$16 sps:$4 sm:$0xff]   ;;  %v3289_v42 = vld [vmem:[#allocation10 + $0x180] ss:$16 sps:$4 sm:$0xff]  }
 0x1e3   :  { %1128 = vmatprep.mubr.bf16.mxu0 %v658_v45  ;;  %v3234_v45 = vld [vmem:[#allocation10 + $0x4c] ss:$16 sps:$4 sm:$0xff]  }
 0x1e4   :  { %1129 = vmatmul.mubr.bf16.vlgmr.msra.gmra.mrb[8].mxu0 %v657_v46  ;;  %v3232_v46 = vld [vmem:[#allocation10 + $0x48] ss:$16 sps:$4 sm:$0xff]  }
 0x1e5   :  { %2034 = vmatpush1.bf16.msra.mxu0 %v3220_v41  ;;  %v3291_v41 = vld [vmem:[#allocation10 + $0x184] ss:$16 sps:$4 sm:$0xff]  }
 0x1e6   :  { %2035 = vmatprep.subr.bf16.mxu0 %v3228_v43  ;;  %v3297_v43 = vld [vmem:[#allocation10 + $0x1a4] ss:$16 sps:$4 sm:$0xff]  }
 0x1e9   :  { %2036 = vmatpush1.bf16.msra.mxu0 %v3226_v44  ;;  %v3295_v44 = vld [vmem:[#allocation10 + $0x1a0] ss:$16 sps:$4 sm:$0xff]  }
 0x1ea   :  { %2037 = vmatprep.subr.bf16.mxu0 %v3234_v45  ;;  %v3303_v45 = vld [vmem:[#allocation10 + $0x1c4] ss:$16 sps:$4 sm:$0xff]  }
 0x1ed   :  { %2038 = vmatpush1.bf16.msra.mxu0 %v3232_v46  ;;  %v3306_v46 = vld [vmem:[#allocation10 + $0x1cc] ss:$16 sps:$4 sm:$0xff]  }
 0x1ee   :  { %2039 = vmatprep.subr.bf16.mxu0 %v3240_v47  ;;  %v3301_v47 = vld [vmem:[#allocation10 + $0x1c0] ss:$16 sps:$4 sm:$0xff]  }
 0x1f1   :  { %2040 = vmatpush1.bf16.msra.mxu0 %v3238_v48  ;;  %v3304_v48 = vld [vmem:[#allocation10 + $0x1c8] ss:$16 sps:$4 sm:$0xff]  }
 0x1f2   :  { %2041 = vmatprep.subr.bf16.mxu0 %v3246_v49  ;;  %v3309_v49 = vld [vmem:[#allocation10 + $0x1e4] ss:$16 sps:$4 sm:$0xff]  }
 0x1f5   :  { %2042 = vmatpush1.bf16.msra.mxu0 %v3244_v52  ;;  %v3312_v52 = vld [vmem:[#allocation10 + $0x1ec] ss:$16 sps:$4 sm:$0xff]  }
 0x2b7   :  { %v1130_v58 = vpop.f32.mrb[8].mxu0 }
 0x2b8   :  { %v2949_v59 = vadd.f32 %v1130_v58, %v728_v56  ;;  %v1132_v60 = vpop.f32.mrb[9].mxu0  ;;  %v3258_v56 = vld [vmem:[#allocation10 + $0xcc] ss:$16 sps:$4 sm:$0xff]  }
 0x2b9   :  { %v2950_v61 = vadd.f32 %v1132_v60, %v732_v57  ;;  %v1134_v62 = vpop.f32.mrb[10].mxu0  ;;  %v3256_v57 = vld [vmem:[#allocation10 + $0xc8] ss:$16 sps:$4 sm:$0xff]   ;;  %v3264_v58 = vld [vmem:[#allocation10 + $0xec] ss:$16 sps:$4 sm:$0xff]  }
 0x2ba   :  { %v1137_v63 = vmax.f32 %v2949_v59, 0.0  ;;  %v1135_v0 = vpop.f32.mrb[11].mxu0  ;;  %v3262_v59 = vld [vmem:[#allocation10 + $0xe8] ss:$16 sps:$4 sm:$0xff]   ;;  %v3270_v60 = vld [vmem:[#allocation10 + $0x10c] ss:$16 sps:$4 sm:$0xff]  }
 0x2bb   :  { %v1138_v1 = vmax.f32 %v2950_v61, 0.0  ;;  %v3268_v61 = vld [vmem:[#allocation10 + $0x108] ss:$16 sps:$4 sm:$0xff]   ;;  %v3276_v62 = vld [vmem:[#allocation10 + $0x12c] ss:$16 sps:$4 sm:$0xff]  }
 0x2bc   :  { %v1139_v4 = vpack.c.bf16 %v1137_v63, %v1137_v63  ;;  %v3274_v63 = vld [vmem:[#allocation10 + $0x128] ss:$16 sps:$4 sm:$0xff]   ;;  %v3282_v0 = vld [vmem:[#allocation10 + $0x14c] ss:$16 sps:$4 sm:$0xff]  }
 0x2bd   :  { %v1140_v2 = vpack.c.bf16 %v1138_v1, %v1138_v1  ;;  %v3280_v1 = vld [vmem:[#allocation10 + $0x148] ss:$16 sps:$4 sm:$0xff]  }
 0x2bf   :  { %1308 = vmatprep.mubr.bf16.mxu1 %v1140_v2  ;;  %v3288_v2 = vld [vmem:[#allocation10 + $0x16c] ss:$16 sps:$4 sm:$0xff]  }
 0x2c0   :  { %1309 = vmatmul.mubr.bf16.vlgmr.msra.gmra.mrb[0].mxu1 %v1139_v4  ;;  %v3294_v4 = vld [vmem:[#allocation10 + $0x18c] ss:$16 sps:$4 sm:$0xff]  }
 0x2c1   :  { %2930 = vmatpush3.bf16.msra.mxu1 %v3185_v3  ;;  %2945 = vmatprep.mubr.msk.bf16.mxu1 %vm3593_vm0, %v3592_v54  ;;  %v3286_v3 = vld [vmem:[#allocation10 + $0x168] ss:$16 sps:$4 sm:$0xff]  }
 0x2c2   :  { %2931 = vmatprep.subr.bf16.mxu1 %v3592_v54 }
 0x2c5   :  { %2932 = vmatpush3.bf16.msra.mxu1 %v3186_v5  ;;  %v3292_v5 = vld [vmem:[#allocation10 + $0x188] ss:$16 sps:$4 sm:$0xff]  }
 0x2c6   :  { %2933 = vmatprep.subr.bf16.mxu1 %v3592_v54 }
 0x2c9   :  { %2934 = vmatpush3.bf16.msra.mxu1 %v3187_v6  ;;  %v3300_v6 = vld [vmem:[#allocation10 + $0x1ac] ss:$16 sps:$4 sm:$0xff]  }
 0x2ca   :  { %2935 = vmatprep.subr.bf16.mxu1 %v3592_v54 }
 0x2cd   :  { %2936 = vmatpush3.bf16.msra.mxu1 %v3188_v7  ;;  %v3298_v7 = vld [vmem:[#allocation10 + $0x1a8] ss:$16 sps:$4 sm:$0xff]  }
 0x2ce   :  { %2937 = vmatprep.subr.bf16.mxu1 %v3592_v54 }
 0x2d1   :  { %2938 = vmatpush3.bf16.msra.mxu1 %v3189_v8  ;;  %v2744_v8 = vld [vmem:[%s3886_s8] ss:$0 sm:$0xff] }
 0x2d2   :  { %2939 = vmatprep.subr.bf16.mxu1 %v3592_v54 }
 0x2d5   :  { %2940 = vmatpush3.bf16.msra.mxu1 %v3190_v9 }
 0x2d6   :  { %2941 = vmatprep.subr.bf16.mxu1 %v3592_v54 }
 0x2d9   :  { %2942 = vmatpush3.bf16.msra.mxu1 %v3191_v10 }
 0x2da   :  { %2943 = vmatprep.subr.bf16.mxu1 %v3592_v54  ;;  %v3252_v54 = vld [vmem:[#allocation10 + $0xac] ss:$16 sps:$4 sm:$0xff]  }
 0x2db   :  { %2043 = vmatprep.subr.bf16.mxu0 %v3252_v54  ;;  %v3307_v54 = vld [vmem:[#allocation10 + $0x1e0] ss:$16 sps:$4 sm:$0xff]  }
 0x2dc   :  { %2044 = vmatpush1.bf16.msra.mxu0 %v3250_v55  ;;  %v3310_v55 = vld [vmem:[#allocation10 + $0x1e8] ss:$16 sps:$4 sm:$0xff]  }
 0x2dd   :  { %2944 = vmatpush3.bf16.msra.mxu1 %v3192_v11  ;;  %2045 = vmatprep.subr.bf16.mxu0 %v3258_v56  ;;  %v3315_v56 = vld [vmem:[#allocation12 + $0x4] ss:$8 sps:$4 sm:$0xff]  }
 0x2de   :  { %1541 = vmatprep.subr.bf16.mxu1 %v3195_v12 }
 0x2e0   :  { %2046 = vmatpush1.bf16.msra.mxu0 %v3256_v57  ;;  %v1449_v57 = vld [vmem:[%s3888_s10] sm:$0x3] }
 0x2e1   :  { %2047 = vmatprep.subr.bf16.mxu0 %v3264_v58  ;;  %v1454_v58 = vrot.slane %v1449_v57, %v3808_v51 }
 0x2e4   :  { %2048 = vmatpush1.bf16.msra.mxu0 %v3262_v59  ;;  %v1458_v59 = vrot.slane %v1449_v57, %v3816_v53 }
 0x2e5   :  { %2049 = vmatprep.subr.bf16.mxu0 %v3270_v60 }
 0x2e8   :  { %2050 = vmatpush1.bf16.msra.mxu0 %v3268_v61 }
 0x2e9   :  { %2051 = vmatprep.subr.bf16.mxu0 %v3276_v62 }
 0x2ec   :  { %2052 = vmatpush1.bf16.msra.mxu0 %v3274_v63 }
 0x2ed   :  { %2053 = vmatprep.subr.bf16.mxu0 %v3282_v0 }
 0x2f0   :  { %2054 = vmatpush1.bf16.msra.mxu0 %v3280_v1 }
 0x2f1   :  { %2055 = vmatprep.subr.bf16.mxu0 %v3288_v2 }
 0x2f4   :  { %2056 = vmatpush1.bf16.msra.mxu0 %v3286_v3 }
 0x2f5   :  { %2057 = vmatprep.subr.bf16.mxu0 %v3294_v4 }
 0x2f8   :  { %2058 = vmatpush1.bf16.msra.mxu0 %v3292_v5  ;;  %v3313_v5 = vld [vmem:[#allocation12] ss:$8 sps:$4 sm:$0xff]  }
 0x2f9   :  { %2059 = vmatprep.subr.bf16.mxu0 %v3300_v6 }
 0x2fc   :  { %2060 = vmatpush1.bf16.msra.mxu0 %v3298_v7  ;;  %v3318_v7 = vld [vmem:[#allocation12 + $0x14] ss:$8 sps:$4 sm:$0xff]  }
 0x2fd   :  { %2061 = vmatprep.subr.bf16.mxu0 %v3306_v46 }
 0x300   :  { %2062 = vmatpush1.bf16.msra.mxu0 %v3304_v48 }
 0x301   :  { %2063 = vmatprep.subr.bf16.mxu0 %v3312_v52 }
 0x304   :  { %2064 = vmatpush1.bf16.msra.mxu0 %v3310_v55 }
 0x393   :  { %v2914_v13 = vpop.f32.mrb[0].mxu1 }
 0x394   :  { %v2915_v15 = vpop.f32.mrb[1].mxu1 }
 0x395   :  { %v2916_v16 = vadd.f32 %v2915_v15, %v2914_v13  ;;  %v2917_v17 = vpop.f32.mrb[2].mxu1  ;;  %v3217_v15 = vld [vmem:[#allocation10] ss:$16 sps:$4 sm:$0xff]  }
 0x396   :  { %v2918_v18 = vpop.f32.mrb[3].mxu1  ;;  %v3225_v17 = vld [vmem:[#allocation10 + $0x24] ss:$16 sps:$4 sm:$0xff]  }
 0x397   :  { %v1311_v19 = vadd.f32 %v2916_v16, %v2727_v14  ;;  %v3223_v18 = vld [vmem:[#allocation10 + $0x20] ss:$16 sps:$4 sm:$0xff]  }
 0x399   :  { %v1316_v20 = vmax.f32 %v1311_v19, 0.0  ;;  %v3231_v19 = vld [vmem:[#allocation10 + $0x44] ss:$16 sps:$4 sm:$0xff]  }
 0x39b   :  { %1317 = vst [vmem:[%s3894_s16] sm:$0x3] %v1316_v20  ;;  %v1318_v22 = vpack.c.bf16 %v1316_v20, %v1316_v20  ;;  %v3229_v20 = vld [vmem:[#allocation10 + $0x40] ss:$16 sps:$4 sm:$0xff]  }
 0x39d   :  { %2946 = vmatmul.mubr.bf16.vlgmr.msra.gmra.mrb[4].mxu1 %v1318_v22  ;;  %v3235_v22 = vld [vmem:[#allocation10 + $0x60] ss:$16 sps:$4 sm:$0xff]  }
 0x39e   :  { %1542 = vmatpush1.bf16.msra.mxu1 %v3193_v21  ;;  %1573 = vmatprep.mubr.bf16.mxu1 %v3594_v39  ;;  %v3237_v21 = vld [vmem:[#allocation10 + $0x64] ss:$16 sps:$4 sm:$0xff]  }
 0x39f   :  { %1543 = vmatprep.subr.bf16.mxu1 %v3198_v23  ;;  %v3243_v23 = vld [vmem:[#allocation10 + $0x84] ss:$16 sps:$4 sm:$0xff]  }
 0x3a0   :  { %v3285_v39 = vld [vmem:[#allocation10 + $0x164] ss:$16 sps:$4 sm:$0xff]  }
 0x3a2   :  { %1544 = vmatpush1.bf16.msra.mxu1 %v3196_v24  ;;  %v3241_v24 = vld [vmem:[#allocation10 + $0x80] ss:$16 sps:$4 sm:$0xff]  }
 0x3a3   :  { %1545 = vmatprep.subr.bf16.mxu1 %v3201_v25  ;;  %v3249_v25 = vld [vmem:[#allocation10 + $0xa4] ss:$16 sps:$4 sm:$0xff]  }
 0x3a6   :  { %1546 = vmatpush1.bf16.msra.mxu1 %v3199_v26  ;;  %v3247_v26 = vld [vmem:[#allocation10 + $0xa0] ss:$16 sps:$4 sm:$0xff]  }
 0x3a7   :  { %1547 = vmatprep.subr.bf16.mxu1 %v3204_v27  ;;  %v3255_v27 = vld [vmem:[#allocation10 + $0xc4] ss:$16 sps:$4 sm:$0xff]  }
 0x3aa   :  { %1548 = vmatpush1.bf16.msra.mxu1 %v3202_v29  ;;  %v3253_v29 = vld [vmem:[#allocation10 + $0xc0] ss:$16 sps:$4 sm:$0xff]  }
 0x3ab   :  { %1549 = vmatprep.subr.bf16.mxu1 %v3207_v31  ;;  %v3261_v31 = vld [vmem:[#allocation10 + $0xe4] ss:$16 sps:$4 sm:$0xff]  }
 0x3ae   :  { %1550 = vmatpush1.bf16.msra.mxu1 %v3205_v32  ;;  %v3259_v32 = vld [vmem:[#allocation10 + $0xe0] ss:$16 sps:$4 sm:$0xff]  }
 0x3af   :  { %1551 = vmatprep.subr.bf16.mxu1 %v3210_v33  ;;  %v3267_v33 = vld [vmem:[#allocation10 + $0x104] ss:$16 sps:$4 sm:$0xff]  }
 0x3b2   :  { %1552 = vmatpush1.bf16.msra.mxu1 %v3208_v34  ;;  %v3265_v34 = vld [vmem:[#allocation10 + $0x100] ss:$16 sps:$4 sm:$0xff]  }
 0x3b3   :  { %1553 = vmatprep.subr.bf16.mxu1 %v3213_v35  ;;  %v3273_v35 = vld [vmem:[#allocation10 + $0x124] ss:$16 sps:$4 sm:$0xff]  }
 0x3b6   :  { %1554 = vmatpush1.bf16.msra.mxu1 %v3211_v36  ;;  %v3271_v36 = vld [vmem:[#allocation10 + $0x120] ss:$16 sps:$4 sm:$0xff]  }
 0x3b7   :  { %1555 = vmatprep.subr.bf16.mxu1 %v3216_v37  ;;  %v3279_v37 = vld [vmem:[#allocation10 + $0x144] ss:$16 sps:$4 sm:$0xff]  }
 0x3ba   :  { %1556 = vmatpush1.bf16.msra.mxu1 %v3214_v38  ;;  %v3277_v38 = vld [vmem:[#allocation10 + $0x140] ss:$16 sps:$4 sm:$0xff]  }
 0x3bb   :  { %1992 = vmatprep.subr.bf16.mxu1 %v3219_v40  ;;  %v3283_v40 = vld [vmem:[#allocation10 + $0x160] ss:$16 sps:$4 sm:$0xff]  }
 0x470   :  { %v1424_v9 = vpop.f32.mrb[4].mxu1 }
 0x471   :  { %v1425_v10 = vadd.f32 %v2744_v8, %v1424_v9  ;;  %v2947_v11 = vpop.f32.mrb[5].mxu1  ;;  %v3316_v8 = vld [vmem:[#allocation12 + $0x10] ss:$8 sps:$4 sm:$0xff]   ;;  %v3321_v9 = vld [vmem:[#allocation12 + $0x24] ss:$8 sps:$4 sm:$0xff]  }
 0x472   :  { %v1427_v12 = vpop.f32.mrb[6].mxu1  ;;  %v3324_v11 = vld [vmem:[#allocation12 + $0x34] ss:$8 sps:$4 sm:$0xff]  }
 0x473   :  { %v1430_v13 = vmax.f32 %v1425_v10, 0.0  ;;  %v2948_v14 = vpop.f32.mrb[7].mxu1  ;;  %v3319_v10 = vld [vmem:[#allocation12 + $0x20] ss:$8 sps:$4 sm:$0xff]   ;;  %v3322_v12 = vld [vmem:[#allocation12 + $0x30] ss:$8 sps:$4 sm:$0xff]  }
 0x474   :  { %v3325_v14 = vld [vmem:[#allocation12 + $0x40] ss:$8 sps:$4 sm:$0xff]  }
 0x475   :  { %1431 = vst [vmem:[%s3895_s17] sm:$0x3] %v1430_v13  ;;  %v1432_v16 = vpack.c.bf16 %v1430_v13, %v1430_v13  ;;  %v3327_v13 = vld [vmem:[#allocation12 + $0x44] ss:$8 sps:$4 sm:$0xff]  }
 0x477   :  { %1574 = vmatmul.mubr.bf16.vlgmr.msra.gmra.mrb[8].mxu1 %v1432_v16  ;;  %v3328_v16 = vld [vmem:[#allocation12 + $0x50] ss:$8 sps:$4 sm:$0xff]  }
 0x478   :  { %1993 = vmatpush1.bf16.msra.mxu1 %v3217_v15  ;;  %v3330_v15 = vld [vmem:[#allocation12 + $0x54] ss:$8 sps:$4 sm:$0xff]  }
 0x479   :  { %1994 = vmatprep.subr.bf16.mxu1 %v3225_v17  ;;  %v3333_v17 = vld [vmem:[#allocation12 + $0x64] ss:$8 sps:$4 sm:$0xff]  }
 0x47c   :  { %1995 = vmatpush1.bf16.msra.mxu1 %v3223_v18  ;;  %v3331_v18 = vld [vmem:[#allocation12 + $0x60] ss:$8 sps:$4 sm:$0xff]  }
 0x47d   :  { %1996 = vmatprep.subr.bf16.mxu1 %v3231_v19  ;;  %v3336_v19 = vld [vmem:[#allocation12 + $0x74] ss:$8 sps:$4 sm:$0xff]  }
 0x480   :  { %1997 = vmatpush1.bf16.msra.mxu1 %v3229_v20  ;;  %v3334_v20 = vld [vmem:[#allocation12 + $0x70] ss:$8 sps:$4 sm:$0xff]  }
 0x481   :  { %1998 = vmatprep.subr.bf16.mxu1 %v3237_v21  ;;  %v3339_v21 = vld [vmem:[#allocation12 + $0x84] ss:$8 sps:$4 sm:$0xff]  }
 0x484   :  { %1999 = vmatpush1.bf16.msra.mxu1 %v3235_v22  ;;  %v3337_v22 = vld [vmem:[#allocation12 + $0x80] ss:$8 sps:$4 sm:$0xff]  }
 0x485   :  { %2000 = vmatprep.subr.bf16.mxu1 %v3243_v23  ;;  %v3342_v23 = vld [vmem:[#allocation12 + $0x94] ss:$8 sps:$4 sm:$0xff]  }
 0x488   :  { %2001 = vmatpush1.bf16.msra.mxu1 %v3241_v24  ;;  %v3340_v24 = vld [vmem:[#allocation12 + $0x90] ss:$8 sps:$4 sm:$0xff]  }
 0x489   :  { %2002 = vmatprep.subr.bf16.mxu1 %v3249_v25  ;;  %v3345_v25 = vld [vmem:[#allocation12 + $0xa4] ss:$8 sps:$4 sm:$0xff]  }
 0x48c   :  { %2003 = vmatpush1.bf16.msra.mxu1 %v3247_v26  ;;  %v3343_v26 = vld [vmem:[#allocation12 + $0xa0] ss:$8 sps:$4 sm:$0xff]  }
 0x48d   :  { %2004 = vmatprep.subr.bf16.mxu1 %v3255_v27  ;;  %v3348_v27 = vld [vmem:[#allocation12 + $0xb4] ss:$8 sps:$4 sm:$0xff]  }
 0x490   :  { %2005 = vmatpush1.bf16.msra.mxu1 %v3253_v29  ;;  %v3346_v29 = vld [vmem:[#allocation12 + $0xb0] ss:$8 sps:$4 sm:$0xff]  }
 0x491   :  { %2006 = vmatprep.subr.bf16.mxu1 %v3261_v31  ;;  %v3351_v31 = vld [vmem:[#allocation12 + $0xc4] ss:$8 sps:$4 sm:$0xff]  }
 0x494   :  { %2007 = vmatpush1.bf16.msra.mxu1 %v3259_v32  ;;  %v3349_v32 = vld [vmem:[#allocation12 + $0xc0] ss:$8 sps:$4 sm:$0xff]  }
 0x495   :  { %2008 = vmatprep.subr.bf16.mxu1 %v3267_v33  ;;  %v3354_v33 = vld [vmem:[#allocation12 + $0xd4] ss:$8 sps:$4 sm:$0xff]  }
 0x498   :  { %2009 = vmatpush1.bf16.msra.mxu1 %v3265_v34  ;;  %v3352_v34 = vld [vmem:[#allocation12 + $0xd0] ss:$8 sps:$4 sm:$0xff]  }
 0x499   :  { %2010 = vmatprep.subr.bf16.mxu1 %v3273_v35  ;;  %v3357_v35 = vld [vmem:[#allocation12 + $0xe4] ss:$8 sps:$4 sm:$0xff]  }
 0x49c   :  { %2011 = vmatpush1.bf16.msra.mxu1 %v3271_v36  ;;  %v3355_v36 = vld [vmem:[#allocation12 + $0xe0] ss:$8 sps:$4 sm:$0xff]  }
 0x49d   :  { %2012 = vmatprep.subr.bf16.mxu1 %v3279_v37  ;;  %v3360_v37 = vld [vmem:[#allocation12 + $0xf4] ss:$8 sps:$4 sm:$0xff]  }
 0x4a0   :  { %2013 = vmatpush1.bf16.msra.mxu1 %v3277_v38  ;;  %v3358_v38 = vld [vmem:[#allocation12 + $0xf0] ss:$8 sps:$4 sm:$0xff]  }
 0x4a1   :  { %2014 = vmatprep.subr.bf16.mxu1 %v3285_v39  ;;  %v3363_v39 = vld [vmem:[#allocation12 + $0x104] ss:$8 sps:$4 sm:$0xff]  }
 0x4a4   :  { %2015 = vmatpush1.bf16.msra.mxu1 %v3283_v40  ;;  %v3855_v40 = vld [vmem:[%s3890_s12] sm:$0xf] }
 0x4a5   :  { %2016 = vmatprep.subr.bf16.mxu1 %v3291_v41  ;;  %v1655_v41 = vrot.slane %v3855_v40, %v3808_v51 }
 0x4a8   :  { %2017 = vmatpush1.bf16.msra.mxu1 %v3289_v42  ;;  %v1659_v42 = vrot.slane %v3855_v40, %v3816_v53 }
 0x4a9   :  { %2018 = vmatprep.subr.bf16.mxu1 %v3297_v43  ;;  %v1667_v43 = vrot.slane %v3855_v40, %v243_v30 }
 0x4ac   :  { %2019 = vmatpush1.bf16.msra.mxu1 %v3295_v44 }
 0x4ad   :  { %2020 = vmatprep.subr.bf16.mxu1 %v3303_v45 }
 0x4b0   :  { %2021 = vmatpush1.bf16.msra.mxu1 %v3301_v47 }
 0x4b1   :  { %2022 = vmatprep.subr.bf16.mxu1 %v3309_v49 }
 0x4b4   :  { %2023 = vmatpush1.bf16.msra.mxu1 %v3307_v54 }
 0x4b5   :  { %2478 = vmatprep.subr.bf16.mxu1 %v3315_v56 }
 0x54a   :  { %v1575_v60 = vpop.f32.mrb[8].mxu1 }
 0x54b   :  { %v1576_v61 = vadd.f32 %v1575_v60, %v1454_v58  ;;  %v1577_v62 = vpop.f32.mrb[9].mxu1 }
 0x54c   :  { %v1578_v63 = vadd.f32 %v1577_v62, %v1458_v59  ;;  %v1579_v0 = vpop.f32.mrb[10].mxu1  ;;  %v3361_v62 = vld [vmem:[#allocation12 + $0x100] ss:$8 sps:$4 sm:$0xff]  }
 0x54d   :  { %v1582_v1 = vmax.f32 %v1576_v61, 0.0  ;;  %v1580_v2 = vpop.f32.mrb[11].mxu1  ;;  %v3366_v0 = vld [vmem:[#allocation12 + $0x114] ss:$8 sps:$4 sm:$0xff]  }
 0x54e   :  { %v1583_v3 = vmax.f32 %v1578_v63, 0.0  ;;  %v3369_v2 = vld [vmem:[#allocation12 + $0x124] ss:$8 sps:$4 sm:$0xff]  }
 0x54f   :  { %v1584_v6 = vpack.c.bf16 %v1582_v1, %v1582_v1  ;;  %v3364_v1 = vld [vmem:[#allocation12 + $0x110] ss:$8 sps:$4 sm:$0xff]  }
 0x550   :  { %v1585_v4 = vpack.c.bf16 %v1583_v3, %v1583_v3  ;;  %v3367_v3 = vld [vmem:[#allocation12 + $0x120] ss:$8 sps:$4 sm:$0xff]  }
 0x552   :  { %2024 = vmatprep.mubr.bf16.mxu1 %v1585_v4  ;;  %2065 = vmatprep.mubr.bf16.mxu0 %v1585_v4  ;;  %v3372_v4 = vld [vmem:[#allocation12 + $0x134] ss:$8 sps:$4 sm:$0xff]  }
 0x553   :  { %2025 = vmatmul.mubr.bf16.vlgmr.msra.gmra.mrb[12].mxu1 %v1584_v6  ;;  %2066 = vmatmul.mubr.bf16.vlgmr.msra.gmra.mrb[12].mxu0 %v1584_v6  ;;  %v3375_v6 = vld [vmem:[#allocation12 + $0x144] ss:$8 sps:$4 sm:$0xff]  }
 0x554   :  { %2479 = vmatpush1.bf16.msra.mxu1 %v3313_v5  ;;  %v3370_v5 = vld [vmem:[#allocation12 + $0x130] ss:$8 sps:$4 sm:$0xff]  }
 0x555   :  { %2480 = vmatprep.subr.bf16.mxu1 %v3318_v7  ;;  %v3373_v7 = vld [vmem:[#allocation12 + $0x140] ss:$8 sps:$4 sm:$0xff]  }
 0x558   :  { %2481 = vmatpush1.bf16.msra.mxu1 %v3316_v8  ;;  %v3378_v8 = vld [vmem:[#allocation12 + $0x154] ss:$8 sps:$4 sm:$0xff]  }
 0x559   :  { %2482 = vmatprep.subr.bf16.mxu1 %v3321_v9  ;;  %v3376_v9 = vld [vmem:[#allocation12 + $0x150] ss:$8 sps:$4 sm:$0xff]  }
 0x55c   :  { %2483 = vmatpush1.bf16.msra.mxu1 %v3319_v10  ;;  %v3381_v10 = vld [vmem:[#allocation12 + $0x164] ss:$8 sps:$4 sm:$0xff]  }
 0x55d   :  { %2484 = vmatprep.subr.bf16.mxu1 %v3324_v11  ;;  %v3379_v11 = vld [vmem:[#allocation12 + $0x160] ss:$8 sps:$4 sm:$0xff]  }
 0x560   :  { %2485 = vmatpush1.bf16.msra.mxu1 %v3322_v12  ;;  %v3384_v12 = vld [vmem:[#allocation12 + $0x174] ss:$8 sps:$4 sm:$0xff]  }
 0x561   :  { %2486 = vmatprep.subr.bf16.mxu1 %v3327_v13  ;;  %v3382_v13 = vld [vmem:[#allocation12 + $0x170] ss:$8 sps:$4 sm:$0xff]  }
 0x564   :  { %2487 = vmatpush1.bf16.msra.mxu1 %v3325_v14  ;;  %v3387_v14 = vld [vmem:[#allocation12 + $0x184] ss:$8 sps:$4 sm:$0xff]  }
 0x565   :  { %2488 = vmatprep.subr.bf16.mxu1 %v3330_v15  ;;  %v3385_v15 = vld [vmem:[#allocation12 + $0x180] ss:$8 sps:$4 sm:$0xff]  }
 0x568   :  { %2489 = vmatpush1.bf16.msra.mxu1 %v3328_v16  ;;  %v3390_v16 = vld [vmem:[#allocation12 + $0x194] ss:$8 sps:$4 sm:$0xff]  }
 0x569   :  { %2490 = vmatprep.subr.bf16.mxu1 %v3333_v17  ;;  %v3388_v17 = vld [vmem:[#allocation12 + $0x190] ss:$8 sps:$4 sm:$0xff]  }
 0x56c   :  { %2491 = vmatpush1.bf16.msra.mxu1 %v3331_v18  ;;  %v3393_v18 = vld [vmem:[#allocation12 + $0x1a4] ss:$8 sps:$4 sm:$0xff]  }
 0x56d   :  { %2492 = vmatprep.subr.bf16.mxu1 %v3336_v19  ;;  %v3391_v19 = vld [vmem:[#allocation12 + $0x1a0] ss:$8 sps:$4 sm:$0xff]  }
 0x570   :  { %2493 = vmatpush1.bf16.msra.mxu1 %v3334_v20  ;;  %v3396_v20 = vld [vmem:[#allocation12 + $0x1b4] ss:$8 sps:$4 sm:$0xff]  }
 0x571   :  { %2494 = vmatprep.subr.bf16.mxu1 %v3339_v21  ;;  %v3394_v21 = vld [vmem:[#allocation12 + $0x1b0] ss:$8 sps:$4 sm:$0xff]  }
 0x574   :  { %2495 = vmatpush1.bf16.msra.mxu1 %v3337_v22  ;;  %v3399_v22 = vld [vmem:[#allocation12 + $0x1c4] ss:$8 sps:$4 sm:$0xff]  }
 0x575   :  { %2496 = vmatprep.subr.bf16.mxu1 %v3342_v23  ;;  %v3397_v23 = vld [vmem:[#allocation12 + $0x1c0] ss:$8 sps:$4 sm:$0xff]  }
 0x578   :  { %2497 = vmatpush1.bf16.msra.mxu1 %v3340_v24  ;;  %v3402_v24 = vld [vmem:[#allocation12 + $0x1d4] ss:$8 sps:$4 sm:$0xff]  }
 0x579   :  { %2498 = vmatprep.subr.bf16.mxu1 %v3345_v25  ;;  %v3400_v25 = vld [vmem:[#allocation12 + $0x1d0] ss:$8 sps:$4 sm:$0xff]  }
 0x57c   :  { %2499 = vmatpush1.bf16.msra.mxu1 %v3343_v26  ;;  %v1663_v26 = vrot.slane %v3855_v40, %v239_v28  ;;  %v2151_v28 = vrot.slane %v2146_v50, %v3808_v51 }
 0x57d   :  { %2500 = vmatprep.subr.bf16.mxu1 %v3348_v27  ;;  %v3405_v27 = vld [vmem:[#allocation12 + $0x1e4] ss:$8 sps:$4 sm:$0xff]  }
 0x580   :  { %2501 = vmatpush1.bf16.msra.mxu1 %v3346_v29  ;;  %v3403_v29 = vld [vmem:[#allocation12 + $0x1e0] ss:$8 sps:$4 sm:$0xff]  }
 0x581   :  { %2502 = vmatprep.subr.bf16.mxu1 %v3351_v31 }
 0x584   :  { %2503 = vmatpush1.bf16.msra.mxu1 %v3349_v32  ;;  %v3408_v32 = vld [vmem:[#allocation12 + $0x1f4] ss:$8 sps:$4 sm:$0xff]  }
 0x585   :  { %2504 = vmatprep.subr.bf16.mxu1 %v3354_v33  ;;  %v3406_v33 = vld [vmem:[#allocation12 + $0x1f0] ss:$8 sps:$4 sm:$0xff]  }
 0x588   :  { %2505 = vmatpush1.bf16.msra.mxu1 %v3352_v34 }
 0x589   :  { %2506 = vmatprep.subr.bf16.mxu1 %v3357_v35 }
 0x58c   :  { %2507 = vmatpush1.bf16.msra.mxu1 %v3355_v36  ;;  %v2155_v36 = vrot.slane %v2146_v50, %v3816_v53 }
 0x58d   :  { %2508 = vmatprep.subr.bf16.mxu1 %v3360_v37 }
 0x590   :  { %2509 = vmatpush1.bf16.msra.mxu1 %v3358_v38 }
 0x591   :  { %2519 = vmatprep.subr.bf16.mxu1 %v3363_v39 }
 0x626   :  { %v2026_v44 = vpop.f32.mrb[12].mxu1  ;;  %v3864_v45 = vpop.f32.mrb[12].mxu0 }
 0x627   :  { %v2027_v46 = vadd.f32 %v2026_v44, %v1655_v41  ;;  %v2028_v47 = vpop.f32.mrb[13].mxu1  ;;  %v2069_v48 = vpop.f32.mrb[13].mxu0  ;;  %v2068_v31 = vadd.f32 %v3864_v45, %v1663_v26 }
 0x628   :  { %v2029_v49 = vadd.f32 %v2028_v47, %v1659_v42  ;;  %v2070_v52 = vadd.f32 %v2069_v48, %v1667_v43  ;;  %v2030_v54 = vpop.f32.mrb[14].mxu1  ;;  %v2071_v55 = vpop.f32.mrb[14].mxu0 }
 0x629   :  { %v2074_v56 = vmax.f32 %v2027_v46, 0.0  ;;  %v2031_v57 = vpop.f32.mrb[15].mxu1  ;;  %v2072_v58 = vpop.f32.mrb[15].mxu0  ;;  %v2076_v34 = vmax.f32 %v2068_v31, 0.0 }
 0x62a   :  { %v2075_v59 = vmax.f32 %v2029_v49, 0.0  ;;  %v2077_v60 = vmax.f32 %v2070_v52, 0.0 }
 0x62b   :  { %v2078_v63 = vpack.c.bf16 %v2074_v56, %v2074_v56  ;;  %v2080_v35 = vpack.c.bf16 %v2076_v34, %v2076_v34 }
 0x62c   :  { %v2079_v61 = vpack.c.bf16 %v2075_v59, %v2075_v59  ;;  %v2081_v30 = vpack.c.bf16 %v2077_v60, %v2077_v60 }
 0x62e   :  { %2510 = vmatprep.mubr.bf16.mxu1 %v2079_v61 }
 0x62f   :  { %2511 = vmatmul.mubr.bf16.vlgmr.msra.gmra.mrb[16].mxu1 %v2078_v63 }
 0x630   :  { %2520 = vmatpush1.bf16.msra.mxu1 %v3361_v62  ;;  %2551 = vmatprep.mubr.bf16.mxu1 %v2081_v30 }
 0x631   :  { %2521 = vmatprep.subr.bf16.mxu1 %v3366_v0 }
 0x634   :  { %2522 = vmatpush1.bf16.msra.mxu1 %v3364_v1 }
 0x635   :  { %2523 = vmatprep.subr.bf16.mxu1 %v3369_v2 }
 0x638   :  { %2524 = vmatpush1.bf16.msra.mxu1 %v3367_v3 }
 0x639   :  { %2525 = vmatprep.subr.bf16.mxu1 %v3372_v4 }
 0x63c   :  { %2526 = vmatpush1.bf16.msra.mxu1 %v3370_v5 }
 0x63d   :  { %2527 = vmatprep.subr.bf16.mxu1 %v3375_v6 }
 0x640   :  { %2528 = vmatpush1.bf16.msra.mxu1 %v3373_v7 }
 0x641   :  { %2529 = vmatprep.subr.bf16.mxu1 %v3378_v8 }
 0x644   :  { %2530 = vmatpush1.bf16.msra.mxu1 %v3376_v9 }
 0x645   :  { %2531 = vmatprep.subr.bf16.mxu1 %v3381_v10 }
 0x648   :  { %2532 = vmatpush1.bf16.msra.mxu1 %v3379_v11 }
 0x649   :  { %2533 = vmatprep.subr.bf16.mxu1 %v3384_v12 }
 0x64c   :  { %2534 = vmatpush1.bf16.msra.mxu1 %v3382_v13 }
 0x64d   :  { %2535 = vmatprep.subr.bf16.mxu1 %v3387_v14 }
 0x650   :  { %2536 = vmatpush1.bf16.msra.mxu1 %v3385_v15 }
 0x651   :  { %2537 = vmatprep.subr.bf16.mxu1 %v3390_v16 }
 0x654   :  { %2538 = vmatpush1.bf16.msra.mxu1 %v3388_v17 }
 0x655   :  { %2539 = vmatprep.subr.bf16.mxu1 %v3393_v18 }
 0x658   :  { %2540 = vmatpush1.bf16.msra.mxu1 %v3391_v19 }
 0x659   :  { %2541 = vmatprep.subr.bf16.mxu1 %v3396_v20 }
 0x65c   :  { %2542 = vmatpush1.bf16.msra.mxu1 %v3394_v21 }
 0x65d   :  { %2543 = vmatprep.subr.bf16.mxu1 %v3399_v22 }
 0x660   :  { %2544 = vmatpush1.bf16.msra.mxu1 %v3397_v23 }
 0x661   :  { %2545 = vmatprep.subr.bf16.mxu1 %v3402_v24 }
 0x664   :  { %2546 = vmatpush1.bf16.msra.mxu1 %v3400_v25 }
 0x665   :  { %2547 = vmatprep.subr.bf16.mxu1 %v3405_v27 }
 0x668   :  { %2548 = vmatpush1.bf16.msra.mxu1 %v3403_v29 }
 0x669   :  { %2549 = vmatprep.subr.bf16.mxu1 %v3408_v32 }
 0x66c   :  { %2550 = vmatpush1.bf16.msra.mxu1 %v3406_v33 }
 0x66f   :  { %2552 = vmatmul.mubr.bf16.vlgmr.msra.gmra.mrb[16].mxu1 %v2080_v35 }
 0x742   :  { %v2553_v37 = vpop.f32.mrb[16].mxu1 }
 0x743   :  { %v2951_v38 = vadd.f32 %v2553_v37, %v2151_v28  ;;  %v2555_v39 = vpop.f32.mrb[17].mxu1 }
 0x744   :  { %v2952_v40 = vadd.f32 %v2555_v39, %v2155_v36  ;;  %v2557_v41 = vpop.f32.mrb[18].mxu1 }
 0x745   :  { %v2560_v42 = vsub.f32 0.0, %v2951_v38  ;;  %v2558_v43 = vpop.f32.mrb[19].mxu1 }
 0x746   :  { %v2561_v44 = vsub.f32 0.0, %v2952_v40 }
 0x747   :  { %v2562_v45 = vmul.f32 1.442695, %v2560_v42 }
 0x748   :  { %v2564_v46 = vmul.f32 1.442695, %v2561_v44 }
 0x749   :  { %3409 = vpow2.f32 %v2562_v45 }
 0x74a   :  { %3411 = vpow2.f32 %v2564_v46 }
 0x753   :  { %v3410_v47 = vpop.eup %3409 }
 0x754   :  { %v3412_v48 = vpop.eup %3411  ;;  %v2566_v49 = vadd.f32 1.0, %v3410_v47 }
 0x755   :  { %v2567_v52 = vadd.f32 1.0, %v3412_v48 }
 0x756   :  { %3413 = vrcp.f32 %v2566_v49 }
 0x757   :  { %3415 = vrcp.f32 %v2567_v52 }
 0x760   :  { %v3414_v51 = vpop.eup %3413 }
 0x761   :  { %v3416_v53 = vpop.eup %3415 }
 0x762   :  { %v2572_v54 = vcombine.low %v3414_v51, %v3416_v53 }
 0x764   :  { %2897 = vst.sshfl [vmem:[%s3893_s15] sm:$0x33 pattern:$0x76325410] %v2572_v54 }
 0x765   :  { %2594 = vsyncpa [#allocation3], 1 }
 0x766   :  { %2595 = vsyncpa [#allocation5], 1 }
 0x767   :  { %2596 = vsyncpa [#allocation8], 1 }
 0x768   :  { %2597 = vsyncpa [#allocation11], 1 }

</bundles_post_ra>
